<compile_context>
chip_gen: v6e
topology: v6e:2x2x1
jax: 0.10.0
libtpu: 0.0.40
codegen_flags: <defaults>
</compile_context>

<pallas_src>
import functools

import jax
import jax.numpy as jnp
from jax import lax
from jax.experimental import pallas as pl
from jax.experimental.pallas import tpu as pltpu


_N_Q = 9       # number of accumulated masked sums
_STRIP = 32    # row-strip height: matches native int8 (32, 128) sublane packing


def _pick_tile(M, pref):
    """Largest multiple of 128 that divides M and is <= pref (needs M % 128 == 0)."""
    t = max(128, min(pref, M))
    t -= t % 128
    while t > 128 and M % t != 0:
        t -= 128
    return t


# ---------------------------------------------------------------------------
# Fused Pallas kernel: gaussian kernel matrix (in-register) + dist = exp(-K)
# + the 9 masked reductions.  Output is a (72, M) slab of per-column partial
# sums; the final 8-sublane + lane reduction happens once in the JAX glue.
#   q0: sum(pos_loss*pos + neg_loss*neg)
#   q1: sum(dist*pos)   q2: sum(pos)
#   q3: sum(dist*neg)   q4: sum(neg)
#   q5: sum(dist*tneg)  q6: sum(tneg)
#   q7: sum(dist*fneg)  q8: sum(fneg)
# ---------------------------------------------------------------------------
def _fused_body(neg_inv_2t2, inv_m, m, xi_ref, xjt_ref, ni_ref, nj_ref,
                pos_ref, neg_ref, tneg_ref, fneg_ref, out_ref):
    # Zero the per-column accumulator slab on the first row tile.
    @pl.when(pl.program_id(1) == 0)
    def _():
        out_ref[...] = jnp.zeros_like(out_ref)

    # MXU matmul in native (tm, D) x (D, tn) layout (no in-kernel transpose).
    dot = lax.dot_general(
        xi_ref[...], xjt_ref[...],
        dimension_numbers=(((1,), (0,)), ((), ())),
        preferred_element_type=jnp.float32)                  # (tm, tn)

    tm, tn = dot.shape
    ni = ni_ref[...]                                         # (tm, 1)
    njb = jnp.broadcast_to(nj_ref[...], (_STRIP, tn))        # hoisted broadcast

    # Strip-wise evaluation keeps elementwise temporaries at (32, tn) and adds
    # directly into the 9 accumulator slabs (no full-tile quantity temps).
    for r in range(tm // _STRIP):
        lo = r * _STRIP
        hi = lo + _STRIP
        # squared distance, clamped against f32 norm cancellation
        sq = jnp.maximum(ni[lo:hi, :] + njb - 2.0 * dot[lo:hi, :], 0.0)
        k = jnp.exp(jnp.sqrt(sq) * neg_inv_2t2)              # gaussian kernel tile
        dist = jnp.exp(-k)                                   # exp(-K), as in reference

        pos = pos_ref[lo:hi, :].astype(jnp.float32)          # int8 -> f32 in-register
        neg = neg_ref[lo:hi, :].astype(jnp.float32)
        tneg = tneg_ref[lo:hi, :].astype(jnp.float32)
        fneg = fneg_ref[lo:hi, :].astype(jnp.float32)

        dp = dist * pos
        dn = dist * neg
        dt = dist * tneg
        df = dist * fneg
        # (1/m) * clamp(sqrt(dist)*(m-dist), 0)^2 == (1/m) * dist * max(m-dist,0)^2
        hinge = jnp.maximum(m - dist, 0.0)
        h2m = hinge * hinge * inv_m                          # hinge^2 / m, once
        q0 = dist * dp + h2m * dn                            # reuses dp / dn products

        quantities = (q0, dp, pos, dn, neg, dt, tneg, df, fneg)
        for q, a in enumerate(quantities):
            # (32, tn) -> (8, tn) with vreg-aligned VPU adds, then accumulate.
            folded = a[0:8, :] + a[8:16, :] + a[16:24, :] + a[24:32, :]
            out_ref[pl.ds(q * 8, 8), :] += folded


def fused_gaussian_masked_sums(x, pos, neg, tneg, fneg, *, t, m,
                               tm=512, tn=512):
    """Single pass over the (M, M) pairwise plane; K never touches HBM."""
    M, D = x.shape
    assert M % 128 == 0, f"num_view*num_smp (= {M}) must be a multiple of 128"
    tm = _pick_tile(M, tm)
    # Keep >= 2 column tiles when possible so the "parallel" axis can use both
    # TensorCores on v7x.
    tn = _pick_tile(M, min(tn, max(128, M // 2)))

    norms = jnp.sum(x * x, axis=1)          # squared row norms, computed once
    n_col = norms[:, None]                  # (M, 1)
    n_row = norms[None, :]                  # (1, M)
    x_t = x.T                               # (D, M): MXU / lane-native rhs layout

    kernel = functools.partial(
        _fused_body, -1.0 / (2.0 * float(t) ** 2), 1.0 / float(m), float(m))

    mask_spec = pl.BlockSpec((tm, tn), lambda j, i: (i, j))
    grid_spec = pltpu.PrefetchScalarGridSpec(
        num_scalar_prefetch=0,
        grid=(M // tn, M // tm),            # (column tiles [parallel], row tiles)
        in_specs=[
            pl.BlockSpec((tm, D), lambda j, i: (i, 0)),   # x rows
            pl.BlockSpec((D, tn), lambda j, i: (0, j)),   # x^T cols, resident per j
            pl.BlockSpec((tm, 1), lambda j, i: (i, 0)),   # row norms (sublane col)
            pl.BlockSpec((1, tn), lambda j, i: (0, j)),   # col norms (lane row)
            mask_spec, mask_spec, mask_spec, mask_spec,
        ],
        out_specs=pl.BlockSpec((_N_Q * 8, tn), lambda j, i: (0, j)),
    )
    partials = pl.pallas_call(
        kernel,
        out_shape=jax.ShapeDtypeStruct((_N_Q * 8, M), jnp.float32),
        grid_spec=grid_spec,
        compiler_params=pltpu.CompilerParams(
            dimension_semantics=("parallel", "arbitrary")),
    )(x, x_t, n_col, n_row, pos, neg, tneg, fneg)
    # Final 8->1 sublane + lane reduction, once, outside the kernel.
    return jnp.sum(partials.reshape(_N_Q, 8, M), axis=(1, 2))   # (9,)


# ---------------------------------------------------------------------------
# Tiny per-view Pallas kernel: the per-view diagonal blocks of K, recomputed
# directly from the features (num_view * num_smp^2 work) for the eigh path.
# ---------------------------------------------------------------------------
def _view_gauss_body(neg_inv_2t2, xv_ref, xvt_ref, nc_ref, nr_ref, out_ref):
    dot = lax.dot_general(
        xv_ref[0], xvt_ref[0],
        dimension_numbers=(((1,), (0,)), ((), ())),
        preferred_element_type=jnp.float32)                   # (S, S)
    sq = jnp.maximum(nc_ref[0] + nr_ref[0] - 2.0 * dot, 0.0)
    out_ref[0] = jnp.exp(jnp.sqrt(sq) * neg_inv_2t2)


def per_view_gaussian(x_views, t):
    V, S, D = x_views.shape
    norms = jnp.sum(x_views * x_views, axis=2)                # (V, S)
    n_col = norms[:, :, None]                                 # (V, S, 1)
    n_row = norms[:, None, :]                                 # (V, 1, S)
    x_t = jnp.swapaxes(x_views, 1, 2)                         # (V, D, S)
    kernel = functools.partial(_view_gauss_body, -1.0 / (2.0 * float(t) ** 2))
    grid_spec = pltpu.PrefetchScalarGridSpec(
        num_scalar_prefetch=0,
        grid=(V,),
        in_specs=[pl.BlockSpec((1, S, D), lambda v: (v, 0, 0)),
                  pl.BlockSpec((1, D, S), lambda v: (v, 0, 0)),
                  pl.BlockSpec((1, S, 1), lambda v: (v, 0, 0)),
                  pl.BlockSpec((1, 1, S), lambda v: (v, 0, 0))],
        out_specs=pl.BlockSpec((1, S, S), lambda v: (v, 0, 0)),
    )
    return pl.pallas_call(
        kernel,
        out_shape=jax.ShapeDtypeStruct((V, S, S), jnp.float32),
        grid_spec=grid_spec,
        compiler_params=pltpu.CompilerParams(dimension_semantics=("parallel",)),
    )(x_views, x_t, n_col, n_row)


# ---------------------------------------------------------------------------
# Full RCMKLoss forward (plain-JAX glue around the Pallas hot paths)
# ---------------------------------------------------------------------------
def rcmk_loss_forward(features, pos_mask, neg_mask, true_neg_mask,
                      false_neg_mask, *, m, kernel_options, num_class,
                      trade_off):
    num_view, num_smp, feat_dim = features.shape
    M = num_view * num_smp
    x = features.reshape(M, feat_dim).astype(jnp.float32)

    assert kernel_options["type"].lower() == "gaussian"
    t = kernel_options["t"]

    # Fused pass: kernel matrix + dist + masked reductions (contrastive loss
    # numerator/denominator and the four no_grad mask averages).
    s = fused_gaussian_masked_sums(x, pos_mask, neg_mask, true_neg_mask,
                                   false_neg_mask, t=t, m=m)
    loss_con = s[0] / (s[2] + s[4])          # sum(pos+neg) = sum(pos)+sum(neg)
    pos_avg = s[1] / s[2]
    neg_avg = s[3] / s[4]
    true_neg_avg = s[5] / s[6]
    false_neg_avg = s[7] / s[8]

    # extra loss: mean of per-view diagonal blocks of K (recomputed directly
    # from the features; full K never materialized).
    k_views = per_view_gaussian(x.reshape(num_view, num_smp, feat_dim), t)
    kernel_mat = jnp.mean(k_views, axis=0)

    # TODO(synk): torch.linalg.eig (general, complex) has no TPU/Pallas
    # equivalent; kernel_mat is symmetric, so eigh on the symmetrized detached
    # matrix with a descending sort yields the same top-num_class subspace.
    sym = lax.stop_gradient(0.5 * (kernel_mat + kernel_mat.T))
    eigvals, eigvecs = jnp.linalg.eigh(sym)
    order = jnp.argsort(-eigvals)
    H = eigvecs[:, order[:num_class]]                      # (num_smp, num_class)
    # TODO(synk): torch.chain_matmul(H, kernel, H.T) only type-checks as
    # H.T @ kernel @ H; that reading is used.
    loss_extra = (jnp.trace(kernel_mat)
                  - jnp.trace(H.T @ kernel_mat @ H)) / num_smp
    H_norm = H / jnp.maximum(
        jnp.linalg.norm(H, axis=1, keepdims=True), 1e-12)  # F.normalize

    loss_all = loss_con + trade_off * loss_extra
    return (H_norm, loss_all, pos_avg, neg_avg, true_neg_avg, false_neg_avg)


# ---------------------------------------------------------------------------
if __name__ == "__main__":
    # module config (its __init__ only stores configuration)
    kernel_options = {"type": "gaussian", "t": 1.0}
    num_class = 4
    trade_off = 0.1
    m = 2.0                    # forward kwarg

    num_view, num_smp, feat_dim = 2, 64, 32
    M = num_view * num_smp     # 128

    key = jax.random.PRNGKey(0)
    k_feat, k_lbl, k_tn = jax.random.split(key, 3)

    features = jax.random.normal(k_feat, (num_view, num_smp, feat_dim),
                                 dtype=jnp.float32)

    # binary indicator masks, stored as int8 (bandwidth-friendly)
    labels = jax.random.randint(k_lbl, (M,), 0, num_class)
    same = labels[:, None] == labels[None, :]
    eye = jnp.eye(M, dtype=bool)
    tn_sel = jax.random.bernoulli(k_tn, 0.7, (M, M))
    pos_mask = (same & ~eye).astype(jnp.int8)
    neg_mask = (~same).astype(jnp.int8)
    true_neg_mask = (~same & tn_sel).astype(jnp.int8)
    false_neg_mask = (~same & ~tn_sel).astype(jnp.int8)

    out = rcmk_loss_forward(features, pos_mask, neg_mask, true_neg_mask,
                            false_neg_mask, m=m,
                            kernel_options=kernel_options,
                            num_class=num_class, trade_off=trade_off)
    out = jax.block_until_ready(out)

    H, loss_all, pos_avg, neg_avg, true_neg_avg, false_neg_avg = out
    assert H.shape == (num_smp, num_class)
    assert jnp.isfinite(loss_all)
    assert all(jnp.isfinite(v) for v in
               (pos_avg, neg_avg, true_neg_avg, false_neg_avg))
    print("KERNEL_OK")
</pallas_src>

<mosaic_0001>
module attributes {stable_mosaic.version = 11 : i64} {
  func.func @_fused_body(%arg0: i32, %arg1: i32, %arg2: memref<128x32xf32, #tpu.memory_space<vmem>>, %arg3: memref<32x128xf32, #tpu.memory_space<vmem>>, %arg4: memref<128x1xf32, #tpu.memory_space<vmem>>, %arg5: memref<1x128xf32, #tpu.memory_space<vmem>>, %arg6: memref<128x128xi8, #tpu.memory_space<vmem>>, %arg7: memref<128x128xi8, #tpu.memory_space<vmem>>, %arg8: memref<128x128xi8, #tpu.memory_space<vmem>>, %arg9: memref<128x128xi8, #tpu.memory_space<vmem>>, %arg10: memref<72x128xf32, #tpu.memory_space<vmem>>) attributes {dimension_semantics = [#tpu.dimension_semantics<parallel>, #tpu.dimension_semantics<arbitrary>], iteration_bounds = array<i64: 1, 1>, scalar_prefetch = 0 : i64, scratch_operands = 0 : i64, tpu.core_type = #tpu.core_type<tc>, window_params = [{transform_indices = @transform_0, window_bounds = array<i64: 128, 32>}, {transform_indices = @transform_1, window_bounds = array<i64: 32, 128>}, {transform_indices = @transform_2, window_bounds = array<i64: 128, 1>}, {transform_indices = @transform_3, window_bounds = array<i64: 1, 128>}, {transform_indices = @transform_4, window_bounds = array<i64: 128, 128>}, {transform_indices = @transform_5, window_bounds = array<i64: 128, 128>}, {transform_indices = @transform_6, window_bounds = array<i64: 128, 128>}, {transform_indices = @transform_7, window_bounds = array<i64: 128, 128>}, {transform_indices = @transform_8, window_bounds = array<i64: 72, 128>}]} {
    %c0_i32 = arith.constant 0 : i32
    %0 = arith.cmpi eq, %arg1, %c0_i32 : i32
    %1 = arith.extui %0 : i1 to i32
    %c0_i32_0 = arith.constant 0 : i32
    %2 = arith.cmpi ne, %1, %c0_i32_0 : i32
    scf.if %2 {
      %cst_203 = arith.constant 0.000000e+00 : f32
      %522 = vector.broadcast %cst_203 : f32 to vector<72x128xf32>
      %c0_204 = arith.constant 0 : index
      %c0_205 = arith.constant 0 : index
      %523 = vector.load %arg10[%c0_204, %c0_205] : memref<72x128xf32, #tpu.memory_space<vmem>>, vector<72x128xf32>
      tpu.vector_store %arg10[%c0_204, %c0_205], %522 {strides = array<i32>} : memref<72x128xf32, #tpu.memory_space<vmem>>, vector<72x128xf32>,
    } else {
    }
    %c0 = arith.constant 0 : index
    %c0_1 = arith.constant 0 : index
    %3 = vector.load %arg2[%c0, %c0_1] : memref<128x32xf32, #tpu.memory_space<vmem>>, vector<128x32xf32>
    %c0_2 = arith.constant 0 : index
    %c0_3 = arith.constant 0 : index
    %4 = vector.load %arg3[%c0_2, %c0_3] : memref<32x128xf32, #tpu.memory_space<vmem>>, vector<32x128xf32>
    %cst = arith.constant dense<0.000000e+00> : vector<128x128xf32>
    %5 = tpu.matmul %3, %4, %cst {dimension_numbers = #tpu.dot_dimension_numbers<[1], [0], [0], [1], [0, 0, 1, 1], [], []>} : vector<128x32xf32>, vector<32x128xf32>, vector<128x128xf32> -> vector<128x128xf32>
    %c0_4 = arith.constant 0 : index
    %c0_5 = arith.constant 0 : index
    %6 = vector.load %arg4[%c0_4, %c0_5] : memref<128x1xf32, #tpu.memory_space<vmem>>, vector<128x1xf32>
    %c0_6 = arith.constant 0 : index
    %c0_7 = arith.constant 0 : index
    %7 = vector.load %arg5[%c0_6, %c0_7] : memref<1x128xf32, #tpu.memory_space<vmem>>, vector<1x128xf32>
    %8 = vector.shape_cast %7 : vector<1x128xf32> to vector<1x128xf32>
    %9 = vector.broadcast %8 : vector<1x128xf32> to vector<32x128xf32>
    %10 = vector.extract_strided_slice %6 {offsets = [0, 0], sizes = [32, 1], strides = [1, 1]} : vector<128x1xf32> to vector<32x1xf32>
    %11 = vector.broadcast %10 : vector<32x1xf32> to vector<32x128xf32>
    %12 = arith.addf %11, %9 : vector<32x128xf32>
    %13 = vector.extract_strided_slice %5 {offsets = [0, 0], sizes = [32, 128], strides = [1, 1]} : vector<128x128xf32> to vector<32x128xf32>
    %cst_8 = arith.constant 2.000000e+00 : f32
    %14 = vector.broadcast %cst_8 : f32 to vector<32x128xf32>
    %15 = arith.mulf %14, %13 : vector<32x128xf32>
    %16 = arith.subf %12, %15 : vector<32x128xf32>
    %cst_9 = arith.constant 0.000000e+00 : f32
    %17 = vector.broadcast %cst_9 : f32 to vector<32x128xf32>
    %18 = arith.maximumf %16, %17 : vector<32x128xf32>
    %19 = math.sqrt %18 : vector<32x128xf32>
    %cst_10 = arith.constant -5.000000e-01 : f32
    %20 = vector.broadcast %cst_10 : f32 to vector<32x128xf32>
    %21 = arith.mulf %19, %20 : vector<32x128xf32>
    %22 = math.exp %21 : vector<32x128xf32>
    %cst_11 = arith.constant 0.000000e+00 : f32
    %23 = vector.broadcast %cst_11 : f32 to vector<32x128xf32>
    %24 = arith.subf %23, %22 : vector<32x128xf32>
    %25 = math.exp %24 : vector<32x128xf32>
    %c0_12 = arith.constant 0 : index
    %c0_13 = arith.constant 0 : index
    %26 = vector.load %arg6[%c0_12, %c0_13] : memref<128x128xi8, #tpu.memory_space<vmem>>, vector<32x128xi8>
    %27 = arith.sitofp %26 : vector<32x128xi8> to vector<32x128xf32>
    %c0_14 = arith.constant 0 : index
    %c0_15 = arith.constant 0 : index
    %28 = vector.load %arg7[%c0_14, %c0_15] : memref<128x128xi8, #tpu.memory_space<vmem>>, vector<32x128xi8>
    %29 = arith.sitofp %28 : vector<32x128xi8> to vector<32x128xf32>
    %c0_16 = arith.constant 0 : index
    %c0_17 = arith.constant 0 : index
    %30 = vector.load %arg8[%c0_16, %c0_17] : memref<128x128xi8, #tpu.memory_space<vmem>>, vector<32x128xi8>
    %31 = arith.sitofp %30 : vector<32x128xi8> to vector<32x128xf32>
    %c0_18 = arith.constant 0 : index
    %c0_19 = arith.constant 0 : index
    %32 = vector.load %arg9[%c0_18, %c0_19] : memref<128x128xi8, #tpu.memory_space<vmem>>, vector<32x128xi8>
    %33 = arith.sitofp %32 : vector<32x128xi8> to vector<32x128xf32>
    %34 = arith.mulf %25, %27 : vector<32x128xf32>
    %35 = arith.mulf %25, %29 : vector<32x128xf32>
    %36 = arith.mulf %25, %31 : vector<32x128xf32>
    %37 = arith.mulf %25, %33 : vector<32x128xf32>
    %cst_20 = arith.constant 2.000000e+00 : f32
    %38 = vector.broadcast %cst_20 : f32 to vector<32x128xf32>
    %39 = arith.subf %38, %25 : vector<32x128xf32>
    %cst_21 = arith.constant 0.000000e+00 : f32
    %40 = vector.broadcast %cst_21 : f32 to vector<32x128xf32>
    %41 = arith.maximumf %39, %40 : vector<32x128xf32>
    %42 = arith.mulf %41, %41 : vector<32x128xf32>
    %cst_22 = arith.constant 5.000000e-01 : f32
    %43 = vector.broadcast %cst_22 : f32 to vector<32x128xf32>
    %44 = arith.mulf %42, %43 : vector<32x128xf32>
    %45 = arith.mulf %25, %34 : vector<32x128xf32>
    %46 = arith.mulf %44, %35 : vector<32x128xf32>
    %47 = arith.addf %45, %46 : vector<32x128xf32>
    %48 = vector.extract_strided_slice %47 {offsets = [0, 0], sizes = [8, 128], strides = [1, 1]} : vector<32x128xf32> to vector<8x128xf32>
    %49 = vector.extract_strided_slice %47 {offsets = [8, 0], sizes = [8, 128], strides = [1, 1]} : vector<32x128xf32> to vector<8x128xf32>
    %50 = arith.addf %48, %49 : vector<8x128xf32>
    %51 = vector.extract_strided_slice %47 {offsets = [16, 0], sizes = [8, 128], strides = [1, 1]} : vector<32x128xf32> to vector<8x128xf32>
    %52 = arith.addf %50, %51 : vector<8x128xf32>
    %53 = vector.extract_strided_slice %47 {offsets = [24, 0], sizes = [8, 128], strides = [1, 1]} : vector<32x128xf32> to vector<8x128xf32>
    %54 = arith.addf %52, %53 : vector<8x128xf32>
    %c0_23 = arith.constant 0 : index
    %c0_24 = arith.constant 0 : index
    %55 = vector.load %arg10[%c0_23, %c0_24] : memref<72x128xf32, #tpu.memory_space<vmem>>, vector<8x128xf32>
    %56 = arith.addf %55, %54 : vector<8x128xf32>
    %c0_25 = arith.constant 0 : index
    %c0_26 = arith.constant 0 : index
    %57 = vector.load %arg10[%c0_25, %c0_26] : memref<72x128xf32, #tpu.memory_space<vmem>>, vector<8x128xf32>
    tpu.vector_store %arg10[%c0_25, %c0_26], %56 {strides = array<i32>} : memref<72x128xf32, #tpu.memory_space<vmem>>, vector<8x128xf32>,
    %58 = vector.extract_strided_slice %34 {offsets = [0, 0], sizes = [8, 128], strides = [1, 1]} : vector<32x128xf32> to vector<8x128xf32>
    %59 = vector.extract_strided_slice %34 {offsets = [8, 0], sizes = [8, 128], strides = [1, 1]} : vector<32x128xf32> to vector<8x128xf32>
    %60 = arith.addf %58, %59 : vector<8x128xf32>
    %61 = vector.extract_strided_slice %34 {offsets = [16, 0], sizes = [8, 128], strides = [1, 1]} : vector<32x128xf32> to vector<8x128xf32>
    %62 = arith.addf %60, %61 : vector<8x128xf32>
    %63 = vector.extract_strided_slice %34 {offsets = [24, 0], sizes = [8, 128], strides = [1, 1]} : vector<32x128xf32> to vector<8x128xf32>
    %64 = arith.addf %62, %63 : vector<8x128xf32>
    %c8 = arith.constant 8 : index
    %c0_27 = arith.constant 0 : index
    %65 = vector.load %arg10[%c8, %c0_27] : memref<72x128xf32, #tpu.memory_space<vmem>>, vector<8x128xf32>
    %66 = arith.addf %65, %64 : vector<8x128xf32>
    %c8_28 = arith.constant 8 : index
    %c0_29 = arith.constant 0 : index
    %67 = vector.load %arg10[%c8_28, %c0_29] : memref<72x128xf32, #tpu.memory_space<vmem>>, vector<8x128xf32>
    tpu.vector_store %arg10[%c8_28, %c0_29], %66 {strides = array<i32>} : memref<72x128xf32, #tpu.memory_space<vmem>>, vector<8x128xf32>,
    %68 = vector.extract_strided_slice %27 {offsets = [0, 0], sizes = [8, 128], strides = [1, 1]} : vector<32x128xf32> to vector<8x128xf32>
    %69 = vector.extract_strided_slice %27 {offsets = [8, 0], sizes = [8, 128], strides = [1, 1]} : vector<32x128xf32> to vector<8x128xf32>
    %70 = arith.addf %68, %69 : vector<8x128xf32>
    %71 = vector.extract_strided_slice %27 {offsets = [16, 0], sizes = [8, 128], strides = [1, 1]} : vector<32x128xf32> to vector<8x128xf32>
    %72 = arith.addf %70, %71 : vector<8x128xf32>
    %73 = vector.extract_strided_slice %27 {offsets = [24, 0], sizes = [8, 128], strides = [1, 1]} : vector<32x128xf32> to vector<8x128xf32>
    %74 = arith.addf %72, %73 : vector<8x128xf32>
    %c16 = arith.constant 16 : index
    %c0_30 = arith.constant 0 : index
    %75 = vector.load %arg10[%c16, %c0_30] : memref<72x128xf32, #tpu.memory_space<vmem>>, vector<8x128xf32>
    %76 = arith.addf %75, %74 : vector<8x128xf32>
    %c16_31 = arith.constant 16 : index
    %c0_32 = arith.constant 0 : index
    %77 = vector.load %arg10[%c16_31, %c0_32] : memref<72x128xf32, #tpu.memory_space<vmem>>, vector<8x128xf32>
    tpu.vector_store %arg10[%c16_31, %c0_32], %76 {strides = array<i32>} : memref<72x128xf32, #tpu.memory_space<vmem>>, vector<8x128xf32>,
    %78 = vector.extract_strided_slice %35 {offsets = [0, 0], sizes = [8, 128], strides = [1, 1]} : vector<32x128xf32> to vector<8x128xf32>
    %79 = vector.extract_strided_slice %35 {offsets = [8, 0], sizes = [8, 128], strides = [1, 1]} : vector<32x128xf32> to vector<8x128xf32>
    %80 = arith.addf %78, %79 : vector<8x128xf32>
    %81 = vector.extract_strided_slice %35 {offsets = [16, 0], sizes = [8, 128], strides = [1, 1]} : vector<32x128xf32> to vector<8x128xf32>
    %82 = arith.addf %80, %81 : vector<8x128xf32>
    %83 = vector.extract_strided_slice %35 {offsets = [24, 0], sizes = [8, 128], strides = [1, 1]} : vector<32x128xf32> to vector<8x128xf32>
    %84 = arith.addf %82, %83 : vector<8x128xf32>
    %c24 = arith.constant 24 : index
    %c0_33 = arith.constant 0 : index
    %85 = vector.load %arg10[%c24, %c0_33] : memref<72x128xf32, #tpu.memory_space<vmem>>, vector<8x128xf32>
    %86 = arith.addf %85, %84 : vector<8x128xf32>
    %c24_34 = arith.constant 24 : index
    %c0_35 = arith.constant 0 : index
    %87 = vector.load %arg10[%c24_34, %c0_35] : memref<72x128xf32, #tpu.memory_space<vmem>>, vector<8x128xf32>
    tpu.vector_store %arg10[%c24_34, %c0_35], %86 {strides = array<i32>} : memref<72x128xf32, #tpu.memory_space<vmem>>, vector<8x128xf32>,
    %88 = vector.extract_strided_slice %29 {offsets = [0, 0], sizes = [8, 128], strides = [1, 1]} : vector<32x128xf32> to vector<8x128xf32>
    %89 = vector.extract_strided_slice %29 {offsets = [8, 0], sizes = [8, 128], strides = [1, 1]} : vector<32x128xf32> to vector<8x128xf32>
    %90 = arith.addf %88, %89 : vector<8x128xf32>
    %91 = vector.extract_strided_slice %29 {offsets = [16, 0], sizes = [8, 128], strides = [1, 1]} : vector<32x128xf32> to vector<8x128xf32>
    %92 = arith.addf %90, %91 : vector<8x128xf32>
    %93 = vector.extract_strided_slice %29 {offsets = [24, 0], sizes = [8, 128], strides = [1, 1]} : vector<32x128xf32> to vector<8x128xf32>
    %94 = arith.addf %92, %93 : vector<8x128xf32>
    %c32 = arith.constant 32 : index
    %c0_36 = arith.constant 0 : index
    %95 = vector.load %arg10[%c32, %c0_36] : memref<72x128xf32, #tpu.memory_space<vmem>>, vector<8x128xf32>
    %96 = arith.addf %95, %94 : vector<8x128xf32>
    %c32_37 = arith.constant 32 : index
    %c0_38 = arith.constant 0 : index
    %97 = vector.load %arg10[%c32_37, %c0_38] : memref<72x128xf32, #tpu.memory_space<vmem>>, vector<8x128xf32>
    tpu.vector_store %arg10[%c32_37, %c0_38], %96 {strides = array<i32>} : memref<72x128xf32, #tpu.memory_space<vmem>>, vector<8x128xf32>,
    %98 = vector.extract_strided_slice %36 {offsets = [0, 0], sizes = [8, 128], strides = [1, 1]} : vector<32x128xf32> to vector<8x128xf32>
    %99 = vector.extract_strided_slice %36 {offsets = [8, 0], sizes = [8, 128], strides = [1, 1]} : vector<32x128xf32> to vector<8x128xf32>
    %100 = arith.addf %98, %99 : vector<8x128xf32>
    %101 = vector.extract_strided_slice %36 {offsets = [16, 0], sizes = [8, 128], strides = [1, 1]} : vector<32x128xf32> to vector<8x128xf32>
    %102 = arith.addf %100, %101 : vector<8x128xf32>
    %103 = vector.extract_strided_slice %36 {offsets = [24, 0], sizes = [8, 128], strides = [1, 1]} : vector<32x128xf32> to vector<8x128xf32>
    %104 = arith.addf %102, %103 : vector<8x128xf32>
    %c40 = arith.constant 40 : index
    %c0_39 = arith.constant 0 : index
    %105 = vector.load %arg10[%c40, %c0_39] : memref<72x128xf32, #tpu.memory_space<vmem>>, vector<8x128xf32>
    %106 = arith.addf %105, %104 : vector<8x128xf32>
    %c40_40 = arith.constant 40 : index
    %c0_41 = arith.constant 0 : index
    %107 = vector.load %arg10[%c40_40, %c0_41] : memref<72x128xf32, #tpu.memory_space<vmem>>, vector<8x128xf32>
    tpu.vector_store %arg10[%c40_40, %c0_41], %106 {strides = array<i32>} : memref<72x128xf32, #tpu.memory_space<vmem>>, vector<8x128xf32>,
    %108 = vector.extract_strided_slice %31 {offsets = [0, 0], sizes = [8, 128], strides = [1, 1]} : vector<32x128xf32> to vector<8x128xf32>
    %109 = vector.extract_strided_slice %31 {offsets = [8, 0], sizes = [8, 128], strides = [1, 1]} : vector<32x128xf32> to vector<8x128xf32>
    %110 = arith.addf %108, %109 : vector<8x128xf32>
    %111 = vector.extract_strided_slice %31 {offsets = [16, 0], sizes = [8, 128], strides = [1, 1]} : vector<32x128xf32> to vector<8x128xf32>
    %112 = arith.addf %110, %111 : vector<8x128xf32>
    %113 = vector.extract_strided_slice %31 {offsets = [24, 0], sizes = [8, 128], strides = [1, 1]} : vector<32x128xf32> to vector<8x128xf32>
    %114 = arith.addf %112, %113 : vector<8x128xf32>
    %c48 = arith.constant 48 : index
    %c0_42 = arith.constant 0 : index
    %115 = vector.load %arg10[%c48, %c0_42] : memref<72x128xf32, #tpu.memory_space<vmem>>, vector<8x128xf32>
    %116 = arith.addf %115, %114 : vector<8x128xf32>
    %c48_43 = arith.constant 48 : index
    %c0_44 = arith.constant 0 : index
    %117 = vector.load %arg10[%c48_43, %c0_44] : memref<72x128xf32, #tpu.memory_space<vmem>>, vector<8x128xf32>
    tpu.vector_store %arg10[%c48_43, %c0_44], %116 {strides = array<i32>} : memref<72x128xf32, #tpu.memory_space<vmem>>, vector<8x128xf32>,
    %118 = vector.extract_strided_slice %37 {offsets = [0, 0], sizes = [8, 128], strides = [1, 1]} : vector<32x128xf32> to vector<8x128xf32>
    %119 = vector.extract_strided_slice %37 {offsets = [8, 0], sizes = [8, 128], strides = [1, 1]} : vector<32x128xf32> to vector<8x128xf32>
    %120 = arith.addf %118, %119 : vector<8x128xf32>
    %121 = vector.extract_strided_slice %37 {offsets = [16, 0], sizes = [8, 128], strides = [1, 1]} : vector<32x128xf32> to vector<8x128xf32>
    %122 = arith.addf %120, %121 : vector<8x128xf32>
    %123 = vector.extract_strided_slice %37 {offsets = [24, 0], sizes = [8, 128], strides = [1, 1]} : vector<32x128xf32> to vector<8x128xf32>
    %124 = arith.addf %122, %123 : vector<8x128xf32>
    %c56 = arith.constant 56 : index
    %c0_45 = arith.constant 0 : index
    %125 = vector.load %arg10[%c56, %c0_45] : memref<72x128xf32, #tpu.memory_space<vmem>>, vector<8x128xf32>
    %126 = arith.addf %125, %124 : vector<8x128xf32>
    %c56_46 = arith.constant 56 : index
    %c0_47 = arith.constant 0 : index
    %127 = vector.load %arg10[%c56_46, %c0_47] : memref<72x128xf32, #tpu.memory_space<vmem>>, vector<8x128xf32>
    tpu.vector_store %arg10[%c56_46, %c0_47], %126 {strides = array<i32>} : memref<72x128xf32, #tpu.memory_space<vmem>>, vector<8x128xf32>,
    %128 = vector.extract_strided_slice %33 {offsets = [0, 0], sizes = [8, 128], strides = [1, 1]} : vector<32x128xf32> to vector<8x128xf32>
    %129 = vector.extract_strided_slice %33 {offsets = [8, 0], sizes = [8, 128], strides = [1, 1]} : vector<32x128xf32> to vector<8x128xf32>
    %130 = arith.addf %128, %129 : vector<8x128xf32>
    %131 = vector.extract_strided_slice %33 {offsets = [16, 0], sizes = [8, 128], strides = [1, 1]} : vector<32x128xf32> to vector<8x128xf32>
    %132 = arith.addf %130, %131 : vector<8x128xf32>
    %133 = vector.extract_strided_slice %33 {offsets = [24, 0], sizes = [8, 128], strides = [1, 1]} : vector<32x128xf32> to vector<8x128xf32>
    %134 = arith.addf %132, %133 : vector<8x128xf32>
    %c64 = arith.constant 64 : index
    %c0_48 = arith.constant 0 : index
    %135 = vector.load %arg10[%c64, %c0_48] : memref<72x128xf32, #tpu.memory_space<vmem>>, vector<8x128xf32>
    %136 = arith.addf %135, %134 : vector<8x128xf32>
    %c64_49 = arith.constant 64 : index
    %c0_50 = arith.constant 0 : index
    %137 = vector.load %arg10[%c64_49, %c0_50] : memref<72x128xf32, #tpu.memory_space<vmem>>, vector<8x128xf32>
    tpu.vector_store %arg10[%c64_49, %c0_50], %136 {strides = array<i32>} : memref<72x128xf32, #tpu.memory_space<vmem>>, vector<8x128xf32>,
    %138 = vector.extract_strided_slice %6 {offsets = [32, 0], sizes = [32, 1], strides = [1, 1]} : vector<128x1xf32> to vector<32x1xf32>
    %139 = vector.broadcast %138 : vector<32x1xf32> to vector<32x128xf32>
    %140 = arith.addf %139, %9 : vector<32x128xf32>
    %141 = vector.extract_strided_slice %5 {offsets = [32, 0], sizes = [32, 128], strides = [1, 1]} : vector<128x128xf32> to vector<32x128xf32>
    %cst_51 = arith.constant 2.000000e+00 : f32
    %142 = vector.broadcast %cst_51 : f32 to vector<32x128xf32>
    %143 = arith.mulf %142, %141 : vector<32x128xf32>
    %144 = arith.subf %140, %143 : vector<32x128xf32>
    %cst_52 = arith.constant 0.000000e+00 : f32
    %145 = vector.broadcast %cst_52 : f32 to vector<32x128xf32>
    %146 = arith.maximumf %144, %145 : vector<32x128xf32>
    %147 = math.sqrt %146 : vector<32x128xf32>
    %cst_53 = arith.constant -5.000000e-01 : f32
    %148 = vector.broadcast %cst_53 : f32 to vector<32x128xf32>
    %149 = arith.mulf %147, %148 : vector<32x128xf32>
    %150 = math.exp %149 : vector<32x128xf32>
    %cst_54 = arith.constant 0.000000e+00 : f32
    %151 = vector.broadcast %cst_54 : f32 to vector<32x128xf32>
    %152 = arith.subf %151, %150 : vector<32x128xf32>
    %153 = math.exp %152 : vector<32x128xf32>
    %c32_55 = arith.constant 32 : index
    %c0_56 = arith.constant 0 : index
    %154 = vector.load %arg6[%c32_55, %c0_56] : memref<128x128xi8, #tpu.memory_space<vmem>>, vector<32x128xi8>
    %155 = arith.sitofp %154 : vector<32x128xi8> to vector<32x128xf32>
    %c32_57 = arith.constant 32 : index
    %c0_58 = arith.constant 0 : index
    %156 = vector.load %arg7[%c32_57, %c0_58] : memref<128x128xi8, #tpu.memory_space<vmem>>, vector<32x128xi8>
    %157 = arith.sitofp %156 : vector<32x128xi8> to vector<32x128xf32>
    %c32_59 = arith.constant 32 : index
    %c0_60 = arith.constant 0 : index
    %158 = vector.load %arg8[%c32_59, %c0_60] : memref<128x128xi8, #tpu.memory_space<vmem>>, vector<32x128xi8>
    %159 = arith.sitofp %158 : vector<32x128xi8> to vector<32x128xf32>
    %c32_61 = arith.constant 32 : index
    %c0_62 = arith.constant 0 : index
    %160 = vector.load %arg9[%c32_61, %c0_62] : memref<128x128xi8, #tpu.memory_space<vmem>>, vector<32x128xi8>
    %161 = arith.sitofp %160 : vector<32x128xi8> to vector<32x128xf32>
    %162 = arith.mulf %153, %155 : vector<32x128xf32>
    %163 = arith.mulf %153, %157 : vector<32x128xf32>
    %164 = arith.mulf %153, %159 : vector<32x128xf32>
    %165 = arith.mulf %153, %161 : vector<32x128xf32>
    %cst_63 = arith.constant 2.000000e+00 : f32
    %166 = vector.broadcast %cst_63 : f32 to vector<32x128xf32>
    %167 = arith.subf %166, %153 : vector<32x128xf32>
    %cst_64 = arith.constant 0.000000e+00 : f32
    %168 = vector.broadcast %cst_64 : f32 to vector<32x128xf32>
    %169 = arith.maximumf %167, %168 : vector<32x128xf32>
    %170 = arith.mulf %169, %169 : vector<32x128xf32>
    %cst_65 = arith.constant 5.000000e-01 : f32
    %171 = vector.broadcast %cst_65 : f32 to vector<32x128xf32>
    %172 = arith.mulf %170, %171 : vector<32x128xf32>
    %173 = arith.mulf %153, %162 : vector<32x128xf32>
    %174 = arith.mulf %172, %163 : vector<32x128xf32>
    %175 = arith.addf %173, %174 : vector<32x128xf32>
    %176 = vector.extract_strided_slice %175 {offsets = [0, 0], sizes = [8, 128], strides = [1, 1]} : vector<32x128xf32> to vector<8x128xf32>
    %177 = vector.extract_strided_slice %175 {offsets = [8, 0], sizes = [8, 128], strides = [1, 1]} : vector<32x128xf32> to vector<8x128xf32>
    %178 = arith.addf %176, %177 : vector<8x128xf32>
    %179 = vector.extract_strided_slice %175 {offsets = [16, 0], sizes = [8, 128], strides = [1, 1]} : vector<32x128xf32> to vector<8x128xf32>
    %180 = arith.addf %178, %179 : vector<8x128xf32>
    %181 = vector.extract_strided_slice %175 {offsets = [24, 0], sizes = [8, 128], strides = [1, 1]} : vector<32x128xf32> to vector<8x128xf32>
    %182 = arith.addf %180, %181 : vector<8x128xf32>
    %c0_66 = arith.constant 0 : index
    %c0_67 = arith.constant 0 : index
    %183 = vector.load %arg10[%c0_66, %c0_67] : memref<72x128xf32, #tpu.memory_space<vmem>>, vector<8x128xf32>
    %184 = arith.addf %183, %182 : vector<8x128xf32>
    %c0_68 = arith.constant 0 : index
    %c0_69 = arith.constant 0 : index
    %185 = vector.load %arg10[%c0_68, %c0_69] : memref<72x128xf32, #tpu.memory_space<vmem>>, vector<8x128xf32>
    tpu.vector_store %arg10[%c0_68, %c0_69], %184 {strides = array<i32>} : memref<72x128xf32, #tpu.memory_space<vmem>>, vector<8x128xf32>,
    %186 = vector.extract_strided_slice %162 {offsets = [0, 0], sizes = [8, 128], strides = [1, 1]} : vector<32x128xf32> to vector<8x128xf32>
    %187 = vector.extract_strided_slice %162 {offsets = [8, 0], sizes = [8, 128], strides = [1, 1]} : vector<32x128xf32> to vector<8x128xf32>
    %188 = arith.addf %186, %187 : vector<8x128xf32>
    %189 = vector.extract_strided_slice %162 {offsets = [16, 0], sizes = [8, 128], strides = [1, 1]} : vector<32x128xf32> to vector<8x128xf32>
    %190 = arith.addf %188, %189 : vector<8x128xf32>
    %191 = vector.extract_strided_slice %162 {offsets = [24, 0], sizes = [8, 128], strides = [1, 1]} : vector<32x128xf32> to vector<8x128xf32>
    %192 = arith.addf %190, %191 : vector<8x128xf32>
    %c8_70 = arith.constant 8 : index
    %c0_71 = arith.constant 0 : index
    %193 = vector.load %arg10[%c8_70, %c0_71] : memref<72x128xf32, #tpu.memory_space<vmem>>, vector<8x128xf32>
    %194 = arith.addf %193, %192 : vector<8x128xf32>
    %c8_72 = arith.constant 8 : index
    %c0_73 = arith.constant 0 : index
    %195 = vector.load %arg10[%c8_72, %c0_73] : memref<72x128xf32, #tpu.memory_space<vmem>>, vector<8x128xf32>
    tpu.vector_store %arg10[%c8_72, %c0_73], %194 {strides = array<i32>} : memref<72x128xf32, #tpu.memory_space<vmem>>, vector<8x128xf32>,
    %196 = vector.extract_strided_slice %155 {offsets = [0, 0], sizes = [8, 128], strides = [1, 1]} : vector<32x128xf32> to vector<8x128xf32>
    %197 = vector.extract_strided_slice %155 {offsets = [8, 0], sizes = [8, 128], strides = [1, 1]} : vector<32x128xf32> to vector<8x128xf32>
    %198 = arith.addf %196, %197 : vector<8x128xf32>
    %199 = vector.extract_strided_slice %155 {offsets = [16, 0], sizes = [8, 128], strides = [1, 1]} : vector<32x128xf32> to vector<8x128xf32>
    %200 = arith.addf %198, %199 : vector<8x128xf32>
    %201 = vector.extract_strided_slice %155 {offsets = [24, 0], sizes = [8, 128], strides = [1, 1]} : vector<32x128xf32> to vector<8x128xf32>
    %202 = arith.addf %200, %201 : vector<8x128xf32>
    %c16_74 = arith.constant 16 : index
    %c0_75 = arith.constant 0 : index
    %203 = vector.load %arg10[%c16_74, %c0_75] : memref<72x128xf32, #tpu.memory_space<vmem>>, vector<8x128xf32>
    %204 = arith.addf %203, %202 : vector<8x128xf32>
    %c16_76 = arith.constant 16 : index
    %c0_77 = arith.constant 0 : index
    %205 = vector.load %arg10[%c16_76, %c0_77] : memref<72x128xf32, #tpu.memory_space<vmem>>, vector<8x128xf32>
    tpu.vector_store %arg10[%c16_76, %c0_77], %204 {strides = array<i32>} : memref<72x128xf32, #tpu.memory_space<vmem>>, vector<8x128xf32>,
    %206 = vector.extract_strided_slice %163 {offsets = [0, 0], sizes = [8, 128], strides = [1, 1]} : vector<32x128xf32> to vector<8x128xf32>
    %207 = vector.extract_strided_slice %163 {offsets = [8, 0], sizes = [8, 128], strides = [1, 1]} : vector<32x128xf32> to vector<8x128xf32>
    %208 = arith.addf %206, %207 : vector<8x128xf32>
    %209 = vector.extract_strided_slice %163 {offsets = [16, 0], sizes = [8, 128], strides = [1, 1]} : vector<32x128xf32> to vector<8x128xf32>
    %210 = arith.addf %208, %209 : vector<8x128xf32>
    %211 = vector.extract_strided_slice %163 {offsets = [24, 0], sizes = [8, 128], strides = [1, 1]} : vector<32x128xf32> to vector<8x128xf32>
    %212 = arith.addf %210, %211 : vector<8x128xf32>
    %c24_78 = arith.constant 24 : index
    %c0_79 = arith.constant 0 : index
    %213 = vector.load %arg10[%c24_78, %c0_79] : memref<72x128xf32, #tpu.memory_space<vmem>>, vector<8x128xf32>
    %214 = arith.addf %213, %212 : vector<8x128xf32>
    %c24_80 = arith.constant 24 : index
    %c0_81 = arith.constant 0 : index
    %215 = vector.load %arg10[%c24_80, %c0_81] : memref<72x128xf32, #tpu.memory_space<vmem>>, vector<8x128xf32>
    tpu.vector_store %arg10[%c24_80, %c0_81], %214 {strides = array<i32>} : memref<72x128xf32, #tpu.memory_space<vmem>>, vector<8x128xf32>,
    %216 = vector.extract_strided_slice %157 {offsets = [0, 0], sizes = [8, 128], strides = [1, 1]} : vector<32x128xf32> to vector<8x128xf32>
    %217 = vector.extract_strided_slice %157 {offsets = [8, 0], sizes = [8, 128], strides = [1, 1]} : vector<32x128xf32> to vector<8x128xf32>
    %218 = arith.addf %216, %217 : vector<8x128xf32>
    %219 = vector.extract_strided_slice %157 {offsets = [16, 0], sizes = [8, 128], strides = [1, 1]} : vector<32x128xf32> to vector<8x128xf32>
    %220 = arith.addf %218, %219 : vector<8x128xf32>
    %221 = vector.extract_strided_slice %157 {offsets = [24, 0], sizes = [8, 128], strides = [1, 1]} : vector<32x128xf32> to vector<8x128xf32>
    %222 = arith.addf %220, %221 : vector<8x128xf32>
    %c32_82 = arith.constant 32 : index
    %c0_83 = arith.constant 0 : index
    %223 = vector.load %arg10[%c32_82, %c0_83] : memref<72x128xf32, #tpu.memory_space<vmem>>, vector<8x128xf32>
    %224 = arith.addf %223, %222 : vector<8x128xf32>
    %c32_84 = arith.constant 32 : index
    %c0_85 = arith.constant 0 : index
    %225 = vector.load %arg10[%c32_84, %c0_85] : memref<72x128xf32, #tpu.memory_space<vmem>>, vector<8x128xf32>
    tpu.vector_store %arg10[%c32_84, %c0_85], %224 {strides = array<i32>} : memref<72x128xf32, #tpu.memory_space<vmem>>, vector<8x128xf32>,
    %226 = vector.extract_strided_slice %164 {offsets = [0, 0], sizes = [8, 128], strides = [1, 1]} : vector<32x128xf32> to vector<8x128xf32>
    %227 = vector.extract_strided_slice %164 {offsets = [8, 0], sizes = [8, 128], strides = [1, 1]} : vector<32x128xf32> to vector<8x128xf32>
    %228 = arith.addf %226, %227 : vector<8x128xf32>
    %229 = vector.extract_strided_slice %164 {offsets = [16, 0], sizes = [8, 128], strides = [1, 1]} : vector<32x128xf32> to vector<8x128xf32>
    %230 = arith.addf %228, %229 : vector<8x128xf32>
    %231 = vector.extract_strided_slice %164 {offsets = [24, 0], sizes = [8, 128], strides = [1, 1]} : vector<32x128xf32> to vector<8x128xf32>
    %232 = arith.addf %230, %231 : vector<8x128xf32>
    %c40_86 = arith.constant 40 : index
    %c0_87 = arith.constant 0 : index
    %233 = vector.load %arg10[%c40_86, %c0_87] : memref<72x128xf32, #tpu.memory_space<vmem>>, vector<8x128xf32>
    %234 = arith.addf %233, %232 : vector<8x128xf32>
    %c40_88 = arith.constant 40 : index
    %c0_89 = arith.constant 0 : index
    %235 = vector.load %arg10[%c40_88, %c0_89] : memref<72x128xf32, #tpu.memory_space<vmem>>, vector<8x128xf32>
    tpu.vector_store %arg10[%c40_88, %c0_89], %234 {strides = array<i32>} : memref<72x128xf32, #tpu.memory_space<vmem>>, vector<8x128xf32>,
    %236 = vector.extract_strided_slice %159 {offsets = [0, 0], sizes = [8, 128], strides = [1, 1]} : vector<32x128xf32> to vector<8x128xf32>
    %237 = vector.extract_strided_slice %159 {offsets = [8, 0], sizes = [8, 128], strides = [1, 1]} : vector<32x128xf32> to vector<8x128xf32>
    %238 = arith.addf %236, %237 : vector<8x128xf32>
    %239 = vector.extract_strided_slice %159 {offsets = [16, 0], sizes = [8, 128], strides = [1, 1]} : vector<32x128xf32> to vector<8x128xf32>
    %240 = arith.addf %238, %239 : vector<8x128xf32>
    %241 = vector.extract_strided_slice %159 {offsets = [24, 0], sizes = [8, 128], strides = [1, 1]} : vector<32x128xf32> to vector<8x128xf32>
    %242 = arith.addf %240, %241 : vector<8x128xf32>
    %c48_90 = arith.constant 48 : index
    %c0_91 = arith.constant 0 : index
    %243 = vector.load %arg10[%c48_90, %c0_91] : memref<72x128xf32, #tpu.memory_space<vmem>>, vector<8x128xf32>
    %244 = arith.addf %243, %242 : vector<8x128xf32>
    %c48_92 = arith.constant 48 : index
    %c0_93 = arith.constant 0 : index
    %245 = vector.load %arg10[%c48_92, %c0_93] : memref<72x128xf32, #tpu.memory_space<vmem>>, vector<8x128xf32>
    tpu.vector_store %arg10[%c48_92, %c0_93], %244 {strides = array<i32>} : memref<72x128xf32, #tpu.memory_space<vmem>>, vector<8x128xf32>,
    %246 = vector.extract_strided_slice %165 {offsets = [0, 0], sizes = [8, 128], strides = [1, 1]} : vector<32x128xf32> to vector<8x128xf32>
    %247 = vector.extract_strided_slice %165 {offsets = [8, 0], sizes = [8, 128], strides = [1, 1]} : vector<32x128xf32> to vector<8x128xf32>
    %248 = arith.addf %246, %247 : vector<8x128xf32>
    %249 = vector.extract_strided_slice %165 {offsets = [16, 0], sizes = [8, 128], strides = [1, 1]} : vector<32x128xf32> to vector<8x128xf32>
    %250 = arith.addf %248, %249 : vector<8x128xf32>
    %251 = vector.extract_strided_slice %165 {offsets = [24, 0], sizes = [8, 128], strides = [1, 1]} : vector<32x128xf32> to vector<8x128xf32>
    %252 = arith.addf %250, %251 : vector<8x128xf32>
    %c56_94 = arith.constant 56 : index
    %c0_95 = arith.constant 0 : index
    %253 = vector.load %arg10[%c56_94, %c0_95] : memref<72x128xf32, #tpu.memory_space<vmem>>, vector<8x128xf32>
    %254 = arith.addf %253, %252 : vector<8x128xf32>
    %c56_96 = arith.constant 56 : index
    %c0_97 = arith.constant 0 : index
    %255 = vector.load %arg10[%c56_96, %c0_97] : memref<72x128xf32, #tpu.memory_space<vmem>>, vector<8x128xf32>
    tpu.vector_store %arg10[%c56_96, %c0_97], %254 {strides = array<i32>} : memref<72x128xf32, #tpu.memory_space<vmem>>, vector<8x128xf32>,
    %256 = vector.extract_strided_slice %161 {offsets = [0, 0], sizes = [8, 128], strides = [1, 1]} : vector<32x128xf32> to vector<8x128xf32>
    %257 = vector.extract_strided_slice %161 {offsets = [8, 0], sizes = [8, 128], strides = [1, 1]} : vector<32x128xf32> to vector<8x128xf32>
    %258 = arith.addf %256, %257 : vector<8x128xf32>
    %259 = vector.extract_strided_slice %161 {offsets = [16, 0], sizes = [8, 128], strides = [1, 1]} : vector<32x128xf32> to vector<8x128xf32>
    %260 = arith.addf %258, %259 : vector<8x128xf32>
    %261 = vector.extract_strided_slice %161 {offsets = [24, 0], sizes = [8, 128], strides = [1, 1]} : vector<32x128xf32> to vector<8x128xf32>
    %262 = arith.addf %260, %261 : vector<8x128xf32>
    %c64_98 = arith.constant 64 : index
    %c0_99 = arith.constant 0 : index
    %263 = vector.load %arg10[%c64_98, %c0_99] : memref<72x128xf32, #tpu.memory_space<vmem>>, vector<8x128xf32>
    %264 = arith.addf %263, %262 : vector<8x128xf32>
    %c64_100 = arith.constant 64 : index
    %c0_101 = arith.constant 0 : index
    %265 = vector.load %arg10[%c64_100, %c0_101] : memref<72x128xf32, #tpu.memory_space<vmem>>, vector<8x128xf32>
    tpu.vector_store %arg10[%c64_100, %c0_101], %264 {strides = array<i32>} : memref<72x128xf32, #tpu.memory_space<vmem>>, vector<8x128xf32>,
    %266 = vector.extract_strided_slice %6 {offsets = [64, 0], sizes = [32, 1], strides = [1, 1]} : vector<128x1xf32> to vector<32x1xf32>
    %267 = vector.broadcast %266 : vector<32x1xf32> to vector<32x128xf32>
    %268 = arith.addf %267, %9 : vector<32x128xf32>
    %269 = vector.extract_strided_slice %5 {offsets = [64, 0], sizes = [32, 128], strides = [1, 1]} : vector<128x128xf32> to vector<32x128xf32>
    %cst_102 = arith.constant 2.000000e+00 : f32
    %270 = vector.broadcast %cst_102 : f32 to vector<32x128xf32>
    %271 = arith.mulf %270, %269 : vector<32x128xf32>
    %272 = arith.subf %268, %271 : vector<32x128xf32>
    %cst_103 = arith.constant 0.000000e+00 : f32
    %273 = vector.broadcast %cst_103 : f32 to vector<32x128xf32>
    %274 = arith.maximumf %272, %273 : vector<32x128xf32>
    %275 = math.sqrt %274 : vector<32x128xf32>
    %cst_104 = arith.constant -5.000000e-01 : f32
    %276 = vector.broadcast %cst_104 : f32 to vector<32x128xf32>
    %277 = arith.mulf %275, %276 : vector<32x128xf32>
    %278 = math.exp %277 : vector<32x128xf32>
    %cst_105 = arith.constant 0.000000e+00 : f32
    %279 = vector.broadcast %cst_105 : f32 to vector<32x128xf32>
    %280 = arith.subf %279, %278 : vector<32x128xf32>
    %281 = math.exp %280 : vector<32x128xf32>
    %c64_106 = arith.constant 64 : index
    %c0_107 = arith.constant 0 : index
    %282 = vector.load %arg6[%c64_106, %c0_107] : memref<128x128xi8, #tpu.memory_space<vmem>>, vector<32x128xi8>
    %283 = arith.sitofp %282 : vector<32x128xi8> to vector<32x128xf32>
    %c64_108 = arith.constant 64 : index
    %c0_109 = arith.constant 0 : index
    %284 = vector.load %arg7[%c64_108, %c0_109] : memref<128x128xi8, #tpu.memory_space<vmem>>, vector<32x128xi8>
    %285 = arith.sitofp %284 : vector<32x128xi8> to vector<32x128xf32>
    %c64_110 = arith.constant 64 : index
    %c0_111 = arith.constant 0 : index
    %286 = vector.load %arg8[%c64_110, %c0_111] : memref<128x128xi8, #tpu.memory_space<vmem>>, vector<32x128xi8>
    %287 = arith.sitofp %286 : vector<32x128xi8> to vector<32x128xf32>
    %c64_112 = arith.constant 64 : index
    %c0_113 = arith.constant 0 : index
    %288 = vector.load %arg9[%c64_112, %c0_113] : memref<128x128xi8, #tpu.memory_space<vmem>>, vector<32x128xi8>
    %289 = arith.sitofp %288 : vector<32x128xi8> to vector<32x128xf32>
    %290 = arith.mulf %281, %283 : vector<32x128xf32>
    %291 = arith.mulf %281, %285 : vector<32x128xf32>
    %292 = arith.mulf %281, %287 : vector<32x128xf32>
    %293 = arith.mulf %281, %289 : vector<32x128xf32>
    %cst_114 = arith.constant 2.000000e+00 : f32
    %294 = vector.broadcast %cst_114 : f32 to vector<32x128xf32>
    %295 = arith.subf %294, %281 : vector<32x128xf32>
    %cst_115 = arith.constant 0.000000e+00 : f32
    %296 = vector.broadcast %cst_115 : f32 to vector<32x128xf32>
    %297 = arith.maximumf %295, %296 : vector<32x128xf32>
    %298 = arith.mulf %297, %297 : vector<32x128xf32>
    %cst_116 = arith.constant 5.000000e-01 : f32
    %299 = vector.broadcast %cst_116 : f32 to vector<32x128xf32>
    %300 = arith.mulf %298, %299 : vector<32x128xf32>
    %301 = arith.mulf %281, %290 : vector<32x128xf32>
    %302 = arith.mulf %300, %291 : vector<32x128xf32>
    %303 = arith.addf %301, %302 : vector<32x128xf32>
    %304 = vector.extract_strided_slice %303 {offsets = [0, 0], sizes = [8, 128], strides = [1, 1]} : vector<32x128xf32> to vector<8x128xf32>
    %305 = vector.extract_strided_slice %303 {offsets = [8, 0], sizes = [8, 128], strides = [1, 1]} : vector<32x128xf32> to vector<8x128xf32>
    %306 = arith.addf %304, %305 : vector<8x128xf32>
    %307 = vector.extract_strided_slice %303 {offsets = [16, 0], sizes = [8, 128], strides = [1, 1]} : vector<32x128xf32> to vector<8x128xf32>
    %308 = arith.addf %306, %307 : vector<8x128xf32>
    %309 = vector.extract_strided_slice %303 {offsets = [24, 0], sizes = [8, 128], strides = [1, 1]} : vector<32x128xf32> to vector<8x128xf32>
    %310 = arith.addf %308, %309 : vector<8x128xf32>
    %c0_117 = arith.constant 0 : index
    %c0_118 = arith.constant 0 : index
    %311 = vector.load %arg10[%c0_117, %c0_118] : memref<72x128xf32, #tpu.memory_space<vmem>>, vector<8x128xf32>
    %312 = arith.addf %311, %310 : vector<8x128xf32>
    %c0_119 = arith.constant 0 : index
    %c0_120 = arith.constant 0 : index
    %313 = vector.load %arg10[%c0_119, %c0_120] : memref<72x128xf32, #tpu.memory_space<vmem>>, vector<8x128xf32>
    tpu.vector_store %arg10[%c0_119, %c0_120], %312 {strides = array<i32>} : memref<72x128xf32, #tpu.memory_space<vmem>>, vector<8x128xf32>,
    %314 = vector.extract_strided_slice %290 {offsets = [0, 0], sizes = [8, 128], strides = [1, 1]} : vector<32x128xf32> to vector<8x128xf32>
    %315 = vector.extract_strided_slice %290 {offsets = [8, 0], sizes = [8, 128], strides = [1, 1]} : vector<32x128xf32> to vector<8x128xf32>
    %316 = arith.addf %314, %315 : vector<8x128xf32>
    %317 = vector.extract_strided_slice %290 {offsets = [16, 0], sizes = [8, 128], strides = [1, 1]} : vector<32x128xf32> to vector<8x128xf32>
    %318 = arith.addf %316, %317 : vector<8x128xf32>
    %319 = vector.extract_strided_slice %290 {offsets = [24, 0], sizes = [8, 128], strides = [1, 1]} : vector<32x128xf32> to vector<8x128xf32>
    %320 = arith.addf %318, %319 : vector<8x128xf32>
    %c8_121 = arith.constant 8 : index
    %c0_122 = arith.constant 0 : index
    %321 = vector.load %arg10[%c8_121, %c0_122] : memref<72x128xf32, #tpu.memory_space<vmem>>, vector<8x128xf32>
    %322 = arith.addf %321, %320 : vector<8x128xf32>
    %c8_123 = arith.constant 8 : index
    %c0_124 = arith.constant 0 : index
    %323 = vector.load %arg10[%c8_123, %c0_124] : memref<72x128xf32, #tpu.memory_space<vmem>>, vector<8x128xf32>
    tpu.vector_store %arg10[%c8_123, %c0_124], %322 {strides = array<i32>} : memref<72x128xf32, #tpu.memory_space<vmem>>, vector<8x128xf32>,
    %324 = vector.extract_strided_slice %283 {offsets = [0, 0], sizes = [8, 128], strides = [1, 1]} : vector<32x128xf32> to vector<8x128xf32>
    %325 = vector.extract_strided_slice %283 {offsets = [8, 0], sizes = [8, 128], strides = [1, 1]} : vector<32x128xf32> to vector<8x128xf32>
    %326 = arith.addf %324, %325 : vector<8x128xf32>
    %327 = vector.extract_strided_slice %283 {offsets = [16, 0], sizes = [8, 128], strides = [1, 1]} : vector<32x128xf32> to vector<8x128xf32>
    %328 = arith.addf %326, %327 : vector<8x128xf32>
    %329 = vector.extract_strided_slice %283 {offsets = [24, 0], sizes = [8, 128], strides = [1, 1]} : vector<32x128xf32> to vector<8x128xf32>
    %330 = arith.addf %328, %329 : vector<8x128xf32>
    %c16_125 = arith.constant 16 : index
    %c0_126 = arith.constant 0 : index
    %331 = vector.load %arg10[%c16_125, %c0_126] : memref<72x128xf32, #tpu.memory_space<vmem>>, vector<8x128xf32>
    %332 = arith.addf %331, %330 : vector<8x128xf32>
    %c16_127 = arith.constant 16 : index
    %c0_128 = arith.constant 0 : index
    %333 = vector.load %arg10[%c16_127, %c0_128] : memref<72x128xf32, #tpu.memory_space<vmem>>, vector<8x128xf32>
    tpu.vector_store %arg10[%c16_127, %c0_128], %332 {strides = array<i32>} : memref<72x128xf32, #tpu.memory_space<vmem>>, vector<8x128xf32>,
    %334 = vector.extract_strided_slice %291 {offsets = [0, 0], sizes = [8, 128], strides = [1, 1]} : vector<32x128xf32> to vector<8x128xf32>
    %335 = vector.extract_strided_slice %291 {offsets = [8, 0], sizes = [8, 128], strides = [1, 1]} : vector<32x128xf32> to vector<8x128xf32>
    %336 = arith.addf %334, %335 : vector<8x128xf32>
    %337 = vector.extract_strided_slice %291 {offsets = [16, 0], sizes = [8, 128], strides = [1, 1]} : vector<32x128xf32> to vector<8x128xf32>
    %338 = arith.addf %336, %337 : vector<8x128xf32>
    %339 = vector.extract_strided_slice %291 {offsets = [24, 0], sizes = [8, 128], strides = [1, 1]} : vector<32x128xf32> to vector<8x128xf32>
    %340 = arith.addf %338, %339 : vector<8x128xf32>
    %c24_129 = arith.constant 24 : index
    %c0_130 = arith.constant 0 : index
    %341 = vector.load %arg10[%c24_129, %c0_130] : memref<72x128xf32, #tpu.memory_space<vmem>>, vector<8x128xf32>
    %342 = arith.addf %341, %340 : vector<8x128xf32>
    %c24_131 = arith.constant 24 : index
    %c0_132 = arith.constant 0 : index
    %343 = vector.load %arg10[%c24_131, %c0_132] : memref<72x128xf32, #tpu.memory_space<vmem>>, vector<8x128xf32>
    tpu.vector_store %arg10[%c24_131, %c0_132], %342 {strides = array<i32>} : memref<72x128xf32, #tpu.memory_space<vmem>>, vector<8x128xf32>,
    %344 = vector.extract_strided_slice %285 {offsets = [0, 0], sizes = [8, 128], strides = [1, 1]} : vector<32x128xf32> to vector<8x128xf32>
    %345 = vector.extract_strided_slice %285 {offsets = [8, 0], sizes = [8, 128], strides = [1, 1]} : vector<32x128xf32> to vector<8x128xf32>
    %346 = arith.addf %344, %345 : vector<8x128xf32>
    %347 = vector.extract_strided_slice %285 {offsets = [16, 0], sizes = [8, 128], strides = [1, 1]} : vector<32x128xf32> to vector<8x128xf32>
    %348 = arith.addf %346, %347 : vector<8x128xf32>
    %349 = vector.extract_strided_slice %285 {offsets = [24, 0], sizes = [8, 128], strides = [1, 1]} : vector<32x128xf32> to vector<8x128xf32>
    %350 = arith.addf %348, %349 : vector<8x128xf32>
    %c32_133 = arith.constant 32 : index
    %c0_134 = arith.constant 0 : index
    %351 = vector.load %arg10[%c32_133, %c0_134] : memref<72x128xf32, #tpu.memory_space<vmem>>, vector<8x128xf32>
    %352 = arith.addf %351, %350 : vector<8x128xf32>
    %c32_135 = arith.constant 32 : index
    %c0_136 = arith.constant 0 : index
    %353 = vector.load %arg10[%c32_135, %c0_136] : memref<72x128xf32, #tpu.memory_space<vmem>>, vector<8x128xf32>
    tpu.vector_store %arg10[%c32_135, %c0_136], %352 {strides = array<i32>} : memref<72x128xf32, #tpu.memory_space<vmem>>, vector<8x128xf32>,
    %354 = vector.extract_strided_slice %292 {offsets = [0, 0], sizes = [8, 128], strides = [1, 1]} : vector<32x128xf32> to vector<8x128xf32>
    %355 = vector.extract_strided_slice %292 {offsets = [8, 0], sizes = [8, 128], strides = [1, 1]} : vector<32x128xf32> to vector<8x128xf32>
    %356 = arith.addf %354, %355 : vector<8x128xf32>
    %357 = vector.extract_strided_slice %292 {offsets = [16, 0], sizes = [8, 128], strides = [1, 1]} : vector<32x128xf32> to vector<8x128xf32>
    %358 = arith.addf %356, %357 : vector<8x128xf32>
    %359 = vector.extract_strided_slice %292 {offsets = [24, 0], sizes = [8, 128], strides = [1, 1]} : vector<32x128xf32> to vector<8x128xf32>
    %360 = arith.addf %358, %359 : vector<8x128xf32>
    %c40_137 = arith.constant 40 : index
    %c0_138 = arith.constant 0 : index
    %361 = vector.load %arg10[%c40_137, %c0_138] : memref<72x128xf32, #tpu.memory_space<vmem>>, vector<8x128xf32>
    %362 = arith.addf %361, %360 : vector<8x128xf32>
    %c40_139 = arith.constant 40 : index
    %c0_140 = arith.constant 0 : index
    %363 = vector.load %arg10[%c40_139, %c0_140] : memref<72x128xf32, #tpu.memory_space<vmem>>, vector<8x128xf32>
    tpu.vector_store %arg10[%c40_139, %c0_140], %362 {strides = array<i32>} : memref<72x128xf32, #tpu.memory_space<vmem>>, vector<8x128xf32>,
    %364 = vector.extract_strided_slice %287 {offsets = [0, 0], sizes = [8, 128], strides = [1, 1]} : vector<32x128xf32> to vector<8x128xf32>
    %365 = vector.extract_strided_slice %287 {offsets = [8, 0], sizes = [8, 128], strides = [1, 1]} : vector<32x128xf32> to vector<8x128xf32>
    %366 = arith.addf %364, %365 : vector<8x128xf32>
    %367 = vector.extract_strided_slice %287 {offsets = [16, 0], sizes = [8, 128], strides = [1, 1]} : vector<32x128xf32> to vector<8x128xf32>
    %368 = arith.addf %366, %367 : vector<8x128xf32>
    %369 = vector.extract_strided_slice %287 {offsets = [24, 0], sizes = [8, 128], strides = [1, 1]} : vector<32x128xf32> to vector<8x128xf32>
    %370 = arith.addf %368, %369 : vector<8x128xf32>
    %c48_141 = arith.constant 48 : index
    %c0_142 = arith.constant 0 : index
    %371 = vector.load %arg10[%c48_141, %c0_142] : memref<72x128xf32, #tpu.memory_space<vmem>>, vector<8x128xf32>
    %372 = arith.addf %371, %370 : vector<8x128xf32>
    %c48_143 = arith.constant 48 : index
    %c0_144 = arith.constant 0 : index
    %373 = vector.load %arg10[%c48_143, %c0_144] : memref<72x128xf32, #tpu.memory_space<vmem>>, vector<8x128xf32>
    tpu.vector_store %arg10[%c48_143, %c0_144], %372 {strides = array<i32>} : memref<72x128xf32, #tpu.memory_space<vmem>>, vector<8x128xf32>,
    %374 = vector.extract_strided_slice %293 {offsets = [0, 0], sizes = [8, 128], strides = [1, 1]} : vector<32x128xf32> to vector<8x128xf32>
    %375 = vector.extract_strided_slice %293 {offsets = [8, 0], sizes = [8, 128], strides = [1, 1]} : vector<32x128xf32> to vector<8x128xf32>
    %376 = arith.addf %374, %375 : vector<8x128xf32>
    %377 = vector.extract_strided_slice %293 {offsets = [16, 0], sizes = [8, 128], strides = [1, 1]} : vector<32x128xf32> to vector<8x128xf32>
    %378 = arith.addf %376, %377 : vector<8x128xf32>
    %379 = vector.extract_strided_slice %293 {offsets = [24, 0], sizes = [8, 128], strides = [1, 1]} : vector<32x128xf32> to vector<8x128xf32>
    %380 = arith.addf %378, %379 : vector<8x128xf32>
    %c56_145 = arith.constant 56 : index
    %c0_146 = arith.constant 0 : index
    %381 = vector.load %arg10[%c56_145, %c0_146] : memref<72x128xf32, #tpu.memory_space<vmem>>, vector<8x128xf32>
    %382 = arith.addf %381, %380 : vector<8x128xf32>
    %c56_147 = arith.constant 56 : index
    %c0_148 = arith.constant 0 : index
    %383 = vector.load %arg10[%c56_147, %c0_148] : memref<72x128xf32, #tpu.memory_space<vmem>>, vector<8x128xf32>
    tpu.vector_store %arg10[%c56_147, %c0_148], %382 {strides = array<i32>} : memref<72x128xf32, #tpu.memory_space<vmem>>, vector<8x128xf32>,
    %384 = vector.extract_strided_slice %289 {offsets = [0, 0], sizes = [8, 128], strides = [1, 1]} : vector<32x128xf32> to vector<8x128xf32>
    %385 = vector.extract_strided_slice %289 {offsets = [8, 0], sizes = [8, 128], strides = [1, 1]} : vector<32x128xf32> to vector<8x128xf32>
    %386 = arith.addf %384, %385 : vector<8x128xf32>
    %387 = vector.extract_strided_slice %289 {offsets = [16, 0], sizes = [8, 128], strides = [1, 1]} : vector<32x128xf32> to vector<8x128xf32>
    %388 = arith.addf %386, %387 : vector<8x128xf32>
    %389 = vector.extract_strided_slice %289 {offsets = [24, 0], sizes = [8, 128], strides = [1, 1]} : vector<32x128xf32> to vector<8x128xf32>
    %390 = arith.addf %388, %389 : vector<8x128xf32>
    %c64_149 = arith.constant 64 : index
    %c0_150 = arith.constant 0 : index
    %391 = vector.load %arg10[%c64_149, %c0_150] : memref<72x128xf32, #tpu.memory_space<vmem>>, vector<8x128xf32>
    %392 = arith.addf %391, %390 : vector<8x128xf32>
    %c64_151 = arith.constant 64 : index
    %c0_152 = arith.constant 0 : index
    %393 = vector.load %arg10[%c64_151, %c0_152] : memref<72x128xf32, #tpu.memory_space<vmem>>, vector<8x128xf32>
    tpu.vector_store %arg10[%c64_151, %c0_152], %392 {strides = array<i32>} : memref<72x128xf32, #tpu.memory_space<vmem>>, vector<8x128xf32>,
    %394 = vector.extract_strided_slice %6 {offsets = [96, 0], sizes = [32, 1], strides = [1, 1]} : vector<128x1xf32> to vector<32x1xf32>
    %395 = vector.broadcast %394 : vector<32x1xf32> to vector<32x128xf32>
    %396 = arith.addf %395, %9 : vector<32x128xf32>
    %397 = vector.extract_strided_slice %5 {offsets = [96, 0], sizes = [32, 128], strides = [1, 1]} : vector<128x128xf32> to vector<32x128xf32>
    %cst_153 = arith.constant 2.000000e+00 : f32
    %398 = vector.broadcast %cst_153 : f32 to vector<32x128xf32>
    %399 = arith.mulf %398, %397 : vector<32x128xf32>
    %400 = arith.subf %396, %399 : vector<32x128xf32>
    %cst_154 = arith.constant 0.000000e+00 : f32
    %401 = vector.broadcast %cst_154 : f32 to vector<32x128xf32>
    %402 = arith.maximumf %400, %401 : vector<32x128xf32>
    %403 = math.sqrt %402 : vector<32x128xf32>
    %cst_155 = arith.constant -5.000000e-01 : f32
    %404 = vector.broadcast %cst_155 : f32 to vector<32x128xf32>
    %405 = arith.mulf %403, %404 : vector<32x128xf32>
    %406 = math.exp %405 : vector<32x128xf32>
    %cst_156 = arith.constant 0.000000e+00 : f32
    %407 = vector.broadcast %cst_156 : f32 to vector<32x128xf32>
    %408 = arith.subf %407, %406 : vector<32x128xf32>
    %409 = math.exp %408 : vector<32x128xf32>
    %c96 = arith.constant 96 : index
    %c0_157 = arith.constant 0 : index
    %410 = vector.load %arg6[%c96, %c0_157] : memref<128x128xi8, #tpu.memory_space<vmem>>, vector<32x128xi8>
    %411 = arith.sitofp %410 : vector<32x128xi8> to vector<32x128xf32>
    %c96_158 = arith.constant 96 : index
    %c0_159 = arith.constant 0 : index
    %412 = vector.load %arg7[%c96_158, %c0_159] : memref<128x128xi8, #tpu.memory_space<vmem>>, vector<32x128xi8>
    %413 = arith.sitofp %412 : vector<32x128xi8> to vector<32x128xf32>
    %c96_160 = arith.constant 96 : index
    %c0_161 = arith.constant 0 : index
    %414 = vector.load %arg8[%c96_160, %c0_161] : memref<128x128xi8, #tpu.memory_space<vmem>>, vector<32x128xi8>
    %415 = arith.sitofp %414 : vector<32x128xi8> to vector<32x128xf32>
    %c96_162 = arith.constant 96 : index
    %c0_163 = arith.constant 0 : index
    %416 = vector.load %arg9[%c96_162, %c0_163] : memref<128x128xi8, #tpu.memory_space<vmem>>, vector<32x128xi8>
    %417 = arith.sitofp %416 : vector<32x128xi8> to vector<32x128xf32>
    %418 = arith.mulf %409, %411 : vector<32x128xf32>
    %419 = arith.mulf %409, %413 : vector<32x128xf32>
    %420 = arith.mulf %409, %415 : vector<32x128xf32>
    %421 = arith.mulf %409, %417 : vector<32x128xf32>
    %cst_164 = arith.constant 2.000000e+00 : f32
    %422 = vector.broadcast %cst_164 : f32 to vector<32x128xf32>
    %423 = arith.subf %422, %409 : vector<32x128xf32>
    %cst_165 = arith.constant 0.000000e+00 : f32
    %424 = vector.broadcast %cst_165 : f32 to vector<32x128xf32>
    %425 = arith.maximumf %423, %424 : vector<32x128xf32>
    %426 = arith.mulf %425, %425 : vector<32x128xf32>
    %cst_166 = arith.constant 5.000000e-01 : f32
    %427 = vector.broadcast %cst_166 : f32 to vector<32x128xf32>
    %428 = arith.mulf %426, %427 : vector<32x128xf32>
    %429 = arith.mulf %409, %418 : vector<32x128xf32>
    %430 = arith.mulf %428, %419 : vector<32x128xf32>
    %431 = arith.addf %429, %430 : vector<32x128xf32>
    %432 = vector.extract_strided_slice %431 {offsets = [0, 0], sizes = [8, 128], strides = [1, 1]} : vector<32x128xf32> to vector<8x128xf32>
    %433 = vector.extract_strided_slice %431 {offsets = [8, 0], sizes = [8, 128], strides = [1, 1]} : vector<32x128xf32> to vector<8x128xf32>
    %434 = arith.addf %432, %433 : vector<8x128xf32>
    %435 = vector.extract_strided_slice %431 {offsets = [16, 0], sizes = [8, 128], strides = [1, 1]} : vector<32x128xf32> to vector<8x128xf32>
    %436 = arith.addf %434, %435 : vector<8x128xf32>
    %437 = vector.extract_strided_slice %431 {offsets = [24, 0], sizes = [8, 128], strides = [1, 1]} : vector<32x128xf32> to vector<8x128xf32>
    %438 = arith.addf %436, %437 : vector<8x128xf32>
    %c0_167 = arith.constant 0 : index
    %c0_168 = arith.constant 0 : index
    %439 = vector.load %arg10[%c0_167, %c0_168] : memref<72x128xf32, #tpu.memory_space<vmem>>, vector<8x128xf32>
    %440 = arith.addf %439, %438 : vector<8x128xf32>
    %c0_169 = arith.constant 0 : index
    %c0_170 = arith.constant 0 : index
    %441 = vector.load %arg10[%c0_169, %c0_170] : memref<72x128xf32, #tpu.memory_space<vmem>>, vector<8x128xf32>
    tpu.vector_store %arg10[%c0_169, %c0_170], %440 {strides = array<i32>} : memref<72x128xf32, #tpu.memory_space<vmem>>, vector<8x128xf32>,
    %442 = vector.extract_strided_slice %418 {offsets = [0, 0], sizes = [8, 128], strides = [1, 1]} : vector<32x128xf32> to vector<8x128xf32>
    %443 = vector.extract_strided_slice %418 {offsets = [8, 0], sizes = [8, 128], strides = [1, 1]} : vector<32x128xf32> to vector<8x128xf32>
    %444 = arith.addf %442, %443 : vector<8x128xf32>
    %445 = vector.extract_strided_slice %418 {offsets = [16, 0], sizes = [8, 128], strides = [1, 1]} : vector<32x128xf32> to vector<8x128xf32>
    %446 = arith.addf %444, %445 : vector<8x128xf32>
    %447 = vector.extract_strided_slice %418 {offsets = [24, 0], sizes = [8, 128], strides = [1, 1]} : vector<32x128xf32> to vector<8x128xf32>
    %448 = arith.addf %446, %447 : vector<8x128xf32>
    %c8_171 = arith.constant 8 : index
    %c0_172 = arith.constant 0 : index
    %449 = vector.load %arg10[%c8_171, %c0_172] : memref<72x128xf32, #tpu.memory_space<vmem>>, vector<8x128xf32>
    %450 = arith.addf %449, %448 : vector<8x128xf32>
    %c8_173 = arith.constant 8 : index
    %c0_174 = arith.constant 0 : index
    %451 = vector.load %arg10[%c8_173, %c0_174] : memref<72x128xf32, #tpu.memory_space<vmem>>, vector<8x128xf32>
    tpu.vector_store %arg10[%c8_173, %c0_174], %450 {strides = array<i32>} : memref<72x128xf32, #tpu.memory_space<vmem>>, vector<8x128xf32>,
    %452 = vector.extract_strided_slice %411 {offsets = [0, 0], sizes = [8, 128], strides = [1, 1]} : vector<32x128xf32> to vector<8x128xf32>
    %453 = vector.extract_strided_slice %411 {offsets = [8, 0], sizes = [8, 128], strides = [1, 1]} : vector<32x128xf32> to vector<8x128xf32>
    %454 = arith.addf %452, %453 : vector<8x128xf32>
    %455 = vector.extract_strided_slice %411 {offsets = [16, 0], sizes = [8, 128], strides = [1, 1]} : vector<32x128xf32> to vector<8x128xf32>
    %456 = arith.addf %454, %455 : vector<8x128xf32>
    %457 = vector.extract_strided_slice %411 {offsets = [24, 0], sizes = [8, 128], strides = [1, 1]} : vector<32x128xf32> to vector<8x128xf32>
    %458 = arith.addf %456, %457 : vector<8x128xf32>
    %c16_175 = arith.constant 16 : index
    %c0_176 = arith.constant 0 : index
    %459 = vector.load %arg10[%c16_175, %c0_176] : memref<72x128xf32, #tpu.memory_space<vmem>>, vector<8x128xf32>
    %460 = arith.addf %459, %458 : vector<8x128xf32>
    %c16_177 = arith.constant 16 : index
    %c0_178 = arith.constant 0 : index
    %461 = vector.load %arg10[%c16_177, %c0_178] : memref<72x128xf32, #tpu.memory_space<vmem>>, vector<8x128xf32>
    tpu.vector_store %arg10[%c16_177, %c0_178], %460 {strides = array<i32>} : memref<72x128xf32, #tpu.memory_space<vmem>>, vector<8x128xf32>,
    %462 = vector.extract_strided_slice %419 {offsets = [0, 0], sizes = [8, 128], strides = [1, 1]} : vector<32x128xf32> to vector<8x128xf32>
    %463 = vector.extract_strided_slice %419 {offsets = [8, 0], sizes = [8, 128], strides = [1, 1]} : vector<32x128xf32> to vector<8x128xf32>
    %464 = arith.addf %462, %463 : vector<8x128xf32>
    %465 = vector.extract_strided_slice %419 {offsets = [16, 0], sizes = [8, 128], strides = [1, 1]} : vector<32x128xf32> to vector<8x128xf32>
    %466 = arith.addf %464, %465 : vector<8x128xf32>
    %467 = vector.extract_strided_slice %419 {offsets = [24, 0], sizes = [8, 128], strides = [1, 1]} : vector<32x128xf32> to vector<8x128xf32>
    %468 = arith.addf %466, %467 : vector<8x128xf32>
    %c24_179 = arith.constant 24 : index
    %c0_180 = arith.constant 0 : index
    %469 = vector.load %arg10[%c24_179, %c0_180] : memref<72x128xf32, #tpu.memory_space<vmem>>, vector<8x128xf32>
    %470 = arith.addf %469, %468 : vector<8x128xf32>
    %c24_181 = arith.constant 24 : index
    %c0_182 = arith.constant 0 : index
    %471 = vector.load %arg10[%c24_181, %c0_182] : memref<72x128xf32, #tpu.memory_space<vmem>>, vector<8x128xf32>
    tpu.vector_store %arg10[%c24_181, %c0_182], %470 {strides = array<i32>} : memref<72x128xf32, #tpu.memory_space<vmem>>, vector<8x128xf32>,
    %472 = vector.extract_strided_slice %413 {offsets = [0, 0], sizes = [8, 128], strides = [1, 1]} : vector<32x128xf32> to vector<8x128xf32>
    %473 = vector.extract_strided_slice %413 {offsets = [8, 0], sizes = [8, 128], strides = [1, 1]} : vector<32x128xf32> to vector<8x128xf32>
    %474 = arith.addf %472, %473 : vector<8x128xf32>
    %475 = vector.extract_strided_slice %413 {offsets = [16, 0], sizes = [8, 128], strides = [1, 1]} : vector<32x128xf32> to vector<8x128xf32>
    %476 = arith.addf %474, %475 : vector<8x128xf32>
    %477 = vector.extract_strided_slice %413 {offsets = [24, 0], sizes = [8, 128], strides = [1, 1]} : vector<32x128xf32> to vector<8x128xf32>
    %478 = arith.addf %476, %477 : vector<8x128xf32>
    %c32_183 = arith.constant 32 : index
    %c0_184 = arith.constant 0 : index
    %479 = vector.load %arg10[%c32_183, %c0_184] : memref<72x128xf32, #tpu.memory_space<vmem>>, vector<8x128xf32>
    %480 = arith.addf %479, %478 : vector<8x128xf32>
    %c32_185 = arith.constant 32 : index
    %c0_186 = arith.constant 0 : index
    %481 = vector.load %arg10[%c32_185, %c0_186] : memref<72x128xf32, #tpu.memory_space<vmem>>, vector<8x128xf32>
    tpu.vector_store %arg10[%c32_185, %c0_186], %480 {strides = array<i32>} : memref<72x128xf32, #tpu.memory_space<vmem>>, vector<8x128xf32>,
    %482 = vector.extract_strided_slice %420 {offsets = [0, 0], sizes = [8, 128], strides = [1, 1]} : vector<32x128xf32> to vector<8x128xf32>
    %483 = vector.extract_strided_slice %420 {offsets = [8, 0], sizes = [8, 128], strides = [1, 1]} : vector<32x128xf32> to vector<8x128xf32>
    %484 = arith.addf %482, %483 : vector<8x128xf32>
    %485 = vector.extract_strided_slice %420 {offsets = [16, 0], sizes = [8, 128], strides = [1, 1]} : vector<32x128xf32> to vector<8x128xf32>
    %486 = arith.addf %484, %485 : vector<8x128xf32>
    %487 = vector.extract_strided_slice %420 {offsets = [24, 0], sizes = [8, 128], strides = [1, 1]} : vector<32x128xf32> to vector<8x128xf32>
    %488 = arith.addf %486, %487 : vector<8x128xf32>
    %c40_187 = arith.constant 40 : index
    %c0_188 = arith.constant 0 : index
    %489 = vector.load %arg10[%c40_187, %c0_188] : memref<72x128xf32, #tpu.memory_space<vmem>>, vector<8x128xf32>
    %490 = arith.addf %489, %488 : vector<8x128xf32>
    %c40_189 = arith.constant 40 : index
    %c0_190 = arith.constant 0 : index
    %491 = vector.load %arg10[%c40_189, %c0_190] : memref<72x128xf32, #tpu.memory_space<vmem>>, vector<8x128xf32>
    tpu.vector_store %arg10[%c40_189, %c0_190], %490 {strides = array<i32>} : memref<72x128xf32, #tpu.memory_space<vmem>>, vector<8x128xf32>,
    %492 = vector.extract_strided_slice %415 {offsets = [0, 0], sizes = [8, 128], strides = [1, 1]} : vector<32x128xf32> to vector<8x128xf32>
    %493 = vector.extract_strided_slice %415 {offsets = [8, 0], sizes = [8, 128], strides = [1, 1]} : vector<32x128xf32> to vector<8x128xf32>
    %494 = arith.addf %492, %493 : vector<8x128xf32>
    %495 = vector.extract_strided_slice %415 {offsets = [16, 0], sizes = [8, 128], strides = [1, 1]} : vector<32x128xf32> to vector<8x128xf32>
    %496 = arith.addf %494, %495 : vector<8x128xf32>
    %497 = vector.extract_strided_slice %415 {offsets = [24, 0], sizes = [8, 128], strides = [1, 1]} : vector<32x128xf32> to vector<8x128xf32>
    %498 = arith.addf %496, %497 : vector<8x128xf32>
    %c48_191 = arith.constant 48 : index
    %c0_192 = arith.constant 0 : index
    %499 = vector.load %arg10[%c48_191, %c0_192] : memref<72x128xf32, #tpu.memory_space<vmem>>, vector<8x128xf32>
    %500 = arith.addf %499, %498 : vector<8x128xf32>
    %c48_193 = arith.constant 48 : index
    %c0_194 = arith.constant 0 : index
    %501 = vector.load %arg10[%c48_193, %c0_194] : memref<72x128xf32, #tpu.memory_space<vmem>>, vector<8x128xf32>
    tpu.vector_store %arg10[%c48_193, %c0_194], %500 {strides = array<i32>} : memref<72x128xf32, #tpu.memory_space<vmem>>, vector<8x128xf32>,
    %502 = vector.extract_strided_slice %421 {offsets = [0, 0], sizes = [8, 128], strides = [1, 1]} : vector<32x128xf32> to vector<8x128xf32>
    %503 = vector.extract_strided_slice %421 {offsets = [8, 0], sizes = [8, 128], strides = [1, 1]} : vector<32x128xf32> to vector<8x128xf32>
    %504 = arith.addf %502, %503 : vector<8x128xf32>
    %505 = vector.extract_strided_slice %421 {offsets = [16, 0], sizes = [8, 128], strides = [1, 1]} : vector<32x128xf32> to vector<8x128xf32>
    %506 = arith.addf %504, %505 : vector<8x128xf32>
    %507 = vector.extract_strided_slice %421 {offsets = [24, 0], sizes = [8, 128], strides = [1, 1]} : vector<32x128xf32> to vector<8x128xf32>
    %508 = arith.addf %506, %507 : vector<8x128xf32>
    %c56_195 = arith.constant 56 : index
    %c0_196 = arith.constant 0 : index
    %509 = vector.load %arg10[%c56_195, %c0_196] : memref<72x128xf32, #tpu.memory_space<vmem>>, vector<8x128xf32>
    %510 = arith.addf %509, %508 : vector<8x128xf32>
    %c56_197 = arith.constant 56 : index
    %c0_198 = arith.constant 0 : index
    %511 = vector.load %arg10[%c56_197, %c0_198] : memref<72x128xf32, #tpu.memory_space<vmem>>, vector<8x128xf32>
    tpu.vector_store %arg10[%c56_197, %c0_198], %510 {strides = array<i32>} : memref<72x128xf32, #tpu.memory_space<vmem>>, vector<8x128xf32>,
    %512 = vector.extract_strided_slice %417 {offsets = [0, 0], sizes = [8, 128], strides = [1, 1]} : vector<32x128xf32> to vector<8x128xf32>
    %513 = vector.extract_strided_slice %417 {offsets = [8, 0], sizes = [8, 128], strides = [1, 1]} : vector<32x128xf32> to vector<8x128xf32>
    %514 = arith.addf %512, %513 : vector<8x128xf32>
    %515 = vector.extract_strided_slice %417 {offsets = [16, 0], sizes = [8, 128], strides = [1, 1]} : vector<32x128xf32> to vector<8x128xf32>
    %516 = arith.addf %514, %515 : vector<8x128xf32>
    %517 = vector.extract_strided_slice %417 {offsets = [24, 0], sizes = [8, 128], strides = [1, 1]} : vector<32x128xf32> to vector<8x128xf32>
    %518 = arith.addf %516, %517 : vector<8x128xf32>
    %c64_199 = arith.constant 64 : index
    %c0_200 = arith.constant 0 : index
    %519 = vector.load %arg10[%c64_199, %c0_200] : memref<72x128xf32, #tpu.memory_space<vmem>>, vector<8x128xf32>
    %520 = arith.addf %519, %518 : vector<8x128xf32>
    %c64_201 = arith.constant 64 : index
    %c0_202 = arith.constant 0 : index
    %521 = vector.load %arg10[%c64_201, %c0_202] : memref<72x128xf32, #tpu.memory_space<vmem>>, vector<8x128xf32>
    tpu.vector_store %arg10[%c64_201, %c0_202], %520 {strides = array<i32>} : memref<72x128xf32, #tpu.memory_space<vmem>>, vector<8x128xf32>,
    return
  }
  func.func @transform_0(%arg0: i32, %arg1: i32) -> (i32, i32) {
    %c0_i32 = arith.constant 0 : i32
    %c0_i32_0 = arith.constant 0 : i32
    return %arg1, %c0_i32 : i32, i32
  }
  func.func @transform_1(%arg0: i32, %arg1: i32) -> (i32, i32) {
    %c0_i32 = arith.constant 0 : i32
    %c0_i32_0 = arith.constant 0 : i32
    return %c0_i32, %arg0 : i32, i32
  }
  func.func @transform_2(%arg0: i32, %arg1: i32) -> (i32, i32) {
    %c0_i32 = arith.constant 0 : i32
    %c0_i32_0 = arith.constant 0 : i32
    return %arg1, %c0_i32 : i32, i32
  }
  func.func @transform_3(%arg0: i32, %arg1: i32) -> (i32, i32) {
    %c0_i32 = arith.constant 0 : i32
    %c0_i32_0 = arith.constant 0 : i32
    return %c0_i32, %arg0 : i32, i32
  }
  func.func @transform_4(%arg0: i32, %arg1: i32) -> (i32, i32) {
    %c0_i32 = arith.constant 0 : i32
    return %arg1, %arg0 : i32, i32
  }
  func.func @transform_5(%arg0: i32, %arg1: i32) -> (i32, i32) {
    %c0_i32 = arith.constant 0 : i32
    return %arg1, %arg0 : i32, i32
  }
  func.func @transform_6(%arg0: i32, %arg1: i32) -> (i32, i32) {
    %c0_i32 = arith.constant 0 : i32
    return %arg1, %arg0 : i32, i32
  }
  func.func @transform_7(%arg0: i32, %arg1: i32) -> (i32, i32) {
    %c0_i32 = arith.constant 0 : i32
    return %arg1, %arg0 : i32, i32
  }
  func.func @transform_8(%arg0: i32, %arg1: i32) -> (i32, i32) {
    %c0_i32 = arith.constant 0 : i32
    %c0_i32_0 = arith.constant 0 : i32
    return %c0_i32, %arg0 : i32, i32
  }
}

</mosaic_0001>

<bundles_post_ra>
// kernel: tpu_custom_call.1
= control target key start
LH: loop header
LB: loop body
LE: loop exit
PB: predicated region body
PF: predicated region fallthrough
CT: control target
= control target key end

     0   :  { %vm63_vm0 = vcmask 261120   ;;  %v1386_v16 = vmov 0   ;;  %s2377_s0 = inlined_call_operand.vmem [shape: f32[128,32], index: 0, kind: input, shape index: {}]   ;;  %s2378_s1 = inlined_call_operand.vmem [shape: f32[32,128], index: 1, kind: input, shape index: {}]   ;;  %s2379_s2 = inlined_call_operand.vmem [shape: f32[128,1], index: 2, kind: input, shape index: {}]   ;;  %s2380_s3 = inlined_call_operand.vmem [shape: f32[1,128], index: 3, kind: input, shape index: {}]   ;;  %s2381_s4 = inlined_call_operand.vmem [shape: s8[128,128], index: 4, kind: input, shape index: {}]   ;;  %s2382_s5 = inlined_call_operand.vmem [shape: s8[128,128], index: 5, kind: input, shape index: {}]   ;;  %s2383_s6 = inlined_call_operand.vmem [shape: s8[128,128], index: 6, kind: input, shape index: {}]   ;;  %s2384_s7 = inlined_call_operand.vmem [shape: s8[128,128], index: 7, kind: input, shape index: {}]   ;;  %s2385_s8 = inlined_call_operand.hbm [shape: f32[72,128], index: 8, kind: output, shape index: {}]  }
   0x1   :  { %v62_v0 = vld [vmem:[%s2378_s1 + $0x18] sm:$0xff]  ;;  %v61_v1 = vld [vmem:[%s2378_s1 + $0x10] sm:$0xff]  ;;  %v60_v2 = vld [vmem:[%s2378_s1 + $0x8] sm:$0xff]  ;;  %1266 = vset.pattern.permute.xlu0 %v1386_v16  ;;  %1267 = vset.pattern.permute.xlu1 %v1386_v16 }
   0x2   :  { %1221 = vmatprep.subr.mxu0 %v62_v0  ;;  %1253 = vmatprep.subr.mxu1 %v62_v0  ;;  %v59_v3 = vld [vmem:[%s2378_s1] sm:$0xff]  ;;  %v44_v6 = vld [vmem:[%s2377_s0 + $0x8] sm:$0xff]  ;;  %v45_v8 = vld [vmem:[%s2377_s0 + $0x10] sm:$0xff] }
   0x3   :  { %1222 = vmatpush3.msra.mxu0 %v62_v0  ;;  %1257 = vmatpush3.msra.mxu1 %v62_v0  ;;  %v43_v4 = vld [vmem:[%s2377_s0] sm:$0xff]  ;;  %v52_v7 = vld [vmem:[%s2377_s0 + $0x48] sm:$0xff]  ;;  %v53_v9 = vld [vmem:[%s2377_s0 + $0x50] sm:$0xff] }
   0x4   :  { %1223 = vmatprep.subr.mxu0 %v61_v1  ;;  %1254 = vmatprep.subr.mxu1 %v61_v1  ;;  %v51_v5 = vld [vmem:[%s2377_s0 + $0x40] sm:$0xff]  ;;  %v259_v11 = vld [vmem:[%s2379_s2 + $0x10] sm:$0xff]  ;;  %v46_v12 = vld [vmem:[%s2377_s0 + $0x18] sm:$0xff] }
   0x5   :  { %1224 = vmatpush3.msra.mxu0 %v61_v1  ;;  %1258 = vmatpush3.msra.mxu1 %v61_v1  ;;  %v257_v10 = vld [vmem:[%s2379_s2] sm:$0xff]  ;;  %v54_v13 = vld [vmem:[%s2377_s0 + $0x58] sm:$0xff] }
   0x6   :  { %1225 = vmatprep.subr.mxu0 %v60_v2  ;;  %1255 = vmatprep.subr.mxu1 %v60_v2  ;;  %v47_v14 = vld [vmem:[%s2377_s0 + $0x20] sm:$0xff] }
   0x7   :  { %1226 = vmatpush3.msra.mxu0 %v60_v2  ;;  %1259 = vmatpush3.msra.mxu1 %v60_v2  ;;  %v55_v15 = vld [vmem:[%s2377_s0 + $0x60] sm:$0xff] }
   0x8   :  { %1227 = vmatprep.subr.mxu0 %v59_v3  ;;  %1256 = vmatprep.subr.mxu1 %v59_v3 }
   0x9   :  { %1228 = vmatpush3.msra.mxu0 %v59_v3  ;;  %1260 = vmatpush3.msra.mxu1 %v59_v3 }
   0xa   :  { %1229 = vmatprep.mubr.msk.f32.mxu0 %vm63_vm0, %v43_v4  ;;  %1241 = vmatprep.mubr.msk.f32.mxu1 %vm63_vm0, %v51_v5 }
   0xb   :  { %1230 = vmatmul.mubr.msk.f32.vlgmr.msra.gmra.mxu0 %vm63_vm0, %v44_v6  ;;  %1242 = vmatmul.mubr.msk.f32.vlgmr.msra.gmra.mxu1 %vm63_vm0, %v52_v7 }
   0xc   :  { %1232 = vmatprep.mubr.msk.f32.mxu0 %vm63_vm0, %v45_v8  ;;  %1244 = vmatprep.mubr.msk.f32.mxu1 %vm63_vm0, %v53_v9 }
   0xd   :  { %13 = vsyncpa [#allocation3], 0  ;;  %282 = vperm.xlu0 %1266, %v257_v10   ;;  %292 = vperm.xlu1 %1267, %v259_v11   ;;  %v258_v17 = vld [vmem:[%s2379_s2 + $0x8] sm:$0xff]  ;;  %v260_v18 = vld [vmem:[%s2379_s2 + $0x18] sm:$0xff] }
   0xe   :  { %v48_v19 = vld [vmem:[%s2377_s0 + $0x28] sm:$0xff]  ;;  %v49_v21 = vld [vmem:[%s2377_s0 + $0x30] sm:$0xff]  ;;  %v261_v23 = vld [vmem:[%s2379_s2 + $0x20] sm:$0xff] }
   0xf   :  { %1233 = vmatmul.mubr.msk.f32.gmra.mxu0 %vm63_vm0, %v46_v12  ;;  %1245 = vmatmul.mubr.msk.f32.gmra.mxu1 %vm63_vm0, %v54_v13  ;;  %v56_v20 = vld [vmem:[%s2377_s0 + $0x68] sm:$0xff]  ;;  %v57_v22 = vld [vmem:[%s2377_s0 + $0x70] sm:$0xff]  ;;  %v50_v25 = vld [vmem:[%s2377_s0 + $0x38] sm:$0xff] }
  0x10   :  { %1235 = vmatprep.mubr.msk.f32.mxu0 %vm63_vm0, %v47_v14  ;;  %1247 = vmatprep.mubr.msk.f32.mxu1 %vm63_vm0, %v55_v15  ;;  %v262_v24 = vld [vmem:[%s2379_s2 + $0x28] sm:$0xff]  ;;  %v58_v26 = vld [vmem:[%s2377_s0 + $0x78] sm:$0xff]  ;;  %v263_v27 = vld [vmem:[%s2379_s2 + $0x30] sm:$0xff] }
  0x11   :  { %287 = vperm.xlu0 %1266, %v258_v17   ;;  %297 = vperm.xlu1 %1267, %v260_v18   ;;  %v264_v28 = vld [vmem:[%s2379_s2 + $0x38] sm:$0xff]  ;;  %v265_v29 = vld [vmem:[%s2379_s2 + $0x40] sm:$0xff]  ;;  %v266_v30 = vld [vmem:[%s2379_s2 + $0x48] sm:$0xff] }
  0x12   :  { %v267_v31 = vld [vmem:[%s2379_s2 + $0x50] sm:$0xff]  ;;  %v268_v32 = vld [vmem:[%s2379_s2 + $0x58] sm:$0xff]  ;;  %v269_v33 = vld [vmem:[%s2379_s2 + $0x60] sm:$0xff] }
  0x13   :  { %1236 = vmatmul.mubr.msk.f32.gmra.mxu0 %vm63_vm0, %v48_v19  ;;  %1248 = vmatmul.mubr.msk.f32.gmra.mxu1 %vm63_vm0, %v56_v20  ;;  %v270_v34 = vld [vmem:[%s2379_s2 + $0x68] sm:$0xff]  ;;  %v271_v35 = vld [vmem:[%s2379_s2 + $0x70] sm:$0xff]  ;;  %v272_v36 = vld [vmem:[%s2379_s2 + $0x78] sm:$0xff] }
  0x14   :  { %1238 = vmatprep.mubr.msk.f32.mxu0 %vm63_vm0, %v49_v21  ;;  %1250 = vmatprep.mubr.msk.f32.mxu1 %vm63_vm0, %v57_v22  ;;  %v1562_v47 = vld [vmem:[%s2380_s3] ss:$0 sm:$0xff] }
  0x15   :  { %504 = vperm.xlu0 %1266, %v261_v23   ;;  %509 = vperm.xlu1 %1267, %v262_v24   ;;  %v368_v48 = vld [vmem:[%s2381_s4] sm:$0xff] }
  0x16   :  { %v377_v49 = vld [vmem:[%s2382_s5] sm:$0xff]  ;;  %v370_v54 = vunpack.c.1.s8 %v368_v48  ;;  %v369_v56 = vunpack.c.0.s8 %v368_v48  ;;  %v371_v2 = vunpack.c.2.s8 %v368_v48  ;;  %v372_v14 = vunpack.c.3.s8 %v368_v48 }
  0x17   :  { %1239 = vmatmul.mubr.msk.f32.gmra.mxu0 %vm63_vm0, %v50_v25  ;;  %1251 = vmatmul.mubr.msk.f32.gmra.mxu1 %vm63_vm0, %v58_v26  ;;  %v386_v50 = vld [vmem:[%s2383_s6] sm:$0xff]  ;;  %v378_v57 = vunpack.c.0.s8 %v377_v49  ;;  %v379_v58 = vunpack.c.1.s8 %v377_v49  ;;  %v380_v6 = vunpack.c.2.s8 %v377_v49  ;;  %v381_v19 = vunpack.c.3.s8 %v377_v49 }
  0x18   :  { %v1582_v59 = vld [vmem:[%s2384_s7] sm:$0xff]  ;;  %v388_v63 = vunpack.c.1.s8 %v386_v50  ;;  %v387_v3 = vunpack.c.0.s8 %v386_v50  ;;  %v1602_v5 = vcvt.s32.f32 %v370_v54  ;;  %v1605_v8 = vcvt.s32.f32 %v369_v56 }
  0x19   :  { %514 = vperm.xlu0 %1266, %v263_v27   ;;  %519 = vperm.xlu1 %1267, %v264_v28   ;;  %v397_v7 = vunpack.c.1.s8 %v1582_v59  ;;  %v1607_v9 = vcvt.s32.f32 %v378_v57  ;;  %v1609_v10 = vcvt.s32.f32 %v379_v58  ;;  %v389_v11 = vunpack.c.2.s8 %v386_v50 }
  0x1a   :  { %2422 = vst [vmem:[#allocation5_spill] sm:$0xff] %v1605_v8  ;;  %v1611_v15 = vcvt.s32.f32 %v387_v3  ;;  %v1613_v16 = vcvt.s32.f32 %v388_v63  ;;  %v396_v17 = vunpack.c.0.s8 %v1582_v59  ;;  %v1616_v18 = vcvt.s32.f32 %v371_v2  ;;  %v599_v3 = vld [vmem:[%s2382_s5 + $0x8] sm:$0xff] }
  0x1b   :  { %2423 = vst [vmem:[#allocation6_spill] sm:$0xff] %v1607_v9  ;;  %v460_v20 = vadd.f32 %v1602_v5, %v1605_v8  ;;  %v472_v21 = vadd.f32 %v1609_v10, %v1607_v9  ;;  %v1622_v22 = vcvt.s32.f32 %v380_v6  ;;  %v390_v23 = vunpack.c.3.s8 %v386_v50  ;;  %v812_v50 = vld [vmem:[%s2381_s4 + $0x10] sm:$0xff] }
  0x1c   :  { %2424 = vst [vmem:[#allocation7_spill] sm:$0xff] %v1611_v15  ;;  %2425 = vst [vmem:[#allocation8_spill] sm:$0xff] %v1616_v18  ;;  %v398_v24 = vunpack.c.2.s8 %v1582_v59  ;;  %v484_v25 = vadd.f32 %v1613_v16, %v1611_v15  ;;  %v1630_v27 = vcvt.s32.f32 %v389_v11  ;;  %v1632_v28 = vcvt.s32.f32 %v396_v17  ;;  %v608_v17 = vld [vmem:[%s2383_s6 + $0x8] sm:$0xff] }
  0x1d   :  { %726 = vperm.xlu0 %1266, %v265_v29   ;;  %731 = vperm.xlu1 %1267, %v266_v30   ;;  %2426 = vst [vmem:[#allocation9_spill] sm:$0xff] %v1622_v22  ;;  %v1634_v29 = vcvt.s32.f32 %v397_v7  ;;  %v814_v7 = vunpack.c.1.s8 %v812_v50 }
  0x1e   :  { %2427 = vst [vmem:[#allocation10_spill] sm:$0xff] %v1630_v27  ;;  %2428 = vst [vmem:[#allocation11_spill] sm:$0xff] %v1632_v28 }
  0x1f   :  { %2429 = vst [vmem:[#allocation12_spill] sm:$0xff] %v1634_v29 }
  0x21   :  { %736 = vperm.xlu0 %1266, %v267_v31   ;;  %741 = vperm.xlu1 %1267, %v268_v32   ;;  %v461_v32 = vadd.f32 %v460_v20, %v1616_v18  ;;  %v601_v20 = vunpack.c.1.s8 %v599_v3 }
  0x25   :  { %948 = vperm.xlu0 %1266, %v269_v33   ;;  %953 = vperm.xlu1 %1267, %v270_v34   ;;  %v473_v33 = vadd.f32 %v472_v21, %v1622_v22  ;;  %v590_v34 = vld [vmem:[%s2381_s4 + $0x8] sm:$0xff] }
  0x26   :  { %v593_v48 = vunpack.c.2.s8 %v590_v34  ;;  %v594_v49 = vunpack.c.3.s8 %v590_v34  ;;  %v617_v21 = vld [vmem:[%s2384_s7 + $0x8] sm:$0xff] }
  0x29   :  { %958 = vperm.xlu0 %1266, %v271_v35   ;;  %963 = vperm.xlu1 %1267, %v272_v36   ;;  %v1650_v36 = vcvt.s32.f32 %v372_v14  ;;  %v1704_v14 = vcvt.s32.f32 %v594_v49  ;;  %v815_v49 = vunpack.c.2.s8 %v812_v50 }
  0x2b   :  { %2430 = vst [vmem:[#allocation13_spill] sm:$0xff] %v1650_v36  ;;  %v1677_v56 = vadd.f32 %v461_v32, %v1650_v36  ;;  %v609_v32 = vunpack.c.0.s8 %v608_v17 }
  0x88   :  { %v283_v37 = vpop.permute.xlu0 %282  ;;  %v293_v38 = vpop.permute.xlu1 %292 }
  0x89   :  { %v1574_v51 = vadd.f32 %v1562_v47, %v283_v37  ;;  %v1577_v55 = vadd.f32 %v1562_v47, %v293_v38  ;;  %v485_v37 = vadd.f32 %v484_v25, %v1630_v27  ;;  %v496_v38 = vadd.f32 %v1634_v29, %v1632_v28 }
  0x8a   :  { %v603_v25 = vunpack.c.3.s8 %v599_v3 }
  0x8c   :  { %v288_v39 = vpop.permute.xlu0 %287  ;;  %v298_v40 = vpop.permute.xlu1 %297 }
  0x8d   :  { %v1585_v60 = vadd.f32 %v1562_v47, %v288_v39  ;;  %v1588_v61 = vadd.f32 %v1562_v47, %v298_v40 }
  0x90   :  { %v505_v41 = vpop.permute.xlu0 %504  ;;  %v510_v42 = vpop.permute.xlu1 %509 }
  0x91   :  { %v1591_v62 = vadd.f32 %v1562_v47, %v505_v41  ;;  %v1594_v0 = vadd.f32 %v1562_v47, %v510_v42  ;;  %v1655_v41 = vcvt.s32.f32 %v381_v19  ;;  %v1657_v42 = vcvt.s32.f32 %v390_v23 }
  0x92   :  { %v600_v19 = vunpack.c.0.s8 %v599_v3 }
  0x93   :  { %2431 = vst [vmem:[#allocation14_spill] sm:$0xff] %v1655_v41  ;;  %2432 = vst [vmem:[#allocation15_spill] sm:$0xff] %v1657_v42  ;;  %v1680_v57 = vadd.f32 %v473_v33, %v1655_v41  ;;  %v1689_v63 = vadd.f32 %v485_v37, %v1657_v42  ;;  %v610_v33 = vunpack.c.1.s8 %v608_v17  ;;  %v612_v37 = vunpack.c.3.s8 %v608_v17 }
  0x94   :  { %v515_v43 = vpop.permute.xlu0 %514  ;;  %v520_v44 = vpop.permute.xlu1 %519 }
  0x95   :  { %v1597_v1 = vadd.f32 %v1562_v47, %v515_v43  ;;  %v1600_v4 = vadd.f32 %v1562_v47, %v520_v44  ;;  %v399_v43 = vunpack.c.3.s8 %v1582_v59  ;;  %v1660_v44 = vcvt.s32.f32 %v398_v24 }
  0x96   :  { %v602_v24 = vunpack.c.2.s8 %v599_v3  ;;  %v1723_v3 = vcvt.s32.f32 %v609_v32  ;;  %v1725_v27 = vcvt.s32.f32 %v610_v33  ;;  %v1729_v22 = vcvt.s32.f32 %v612_v37 }
  0x97   :  { %2433 = vst [vmem:[#allocation16_spill] sm:$0xff] %v1660_v44  ;;  %v497_v2 = vadd.f32 %v496_v38, %v1660_v44  ;;  %v1695_v6 = vcvt.s32.f32 %v399_v43  ;;  %v618_v38 = vunpack.c.0.s8 %v617_v21  ;;  %v621_v43 = vunpack.c.3.s8 %v617_v21 }
  0x98   :  { %v727_v45 = vpop.permute.xlu0 %726  ;;  %v732_v46 = vpop.permute.xlu1 %731  ;;  %v1719_v44 = vcvt.s32.f32 %v602_v24  ;;  %2442 = vst [vmem:[#allocation25_spill] sm:$0xff] %v1723_v3  ;;  %2443 = vst [vmem:[#allocation26_spill] sm:$0xff] %v1725_v27  ;;  %v1746_v32 = vcvt.s32.f32 %v815_v49 }
  0x99   :  { %v1628_v26 = vadd.f32 %v1562_v47, %v727_v45  ;;  %v1637_v30 = vadd.f32 %v1562_v47, %v732_v46  ;;  %v591_v45 = vunpack.c.0.s8 %v590_v34  ;;  %v592_v46 = vunpack.c.1.s8 %v590_v34  ;;  %2434 = vst [vmem:[#allocation17_spill] sm:$0xff] %v1695_v6 }
  0x9a   :  { %v1713_v23 = vadd.f32 %v497_v2, %v1695_v6  ;;  %v611_v34 = vunpack.c.2.s8 %v608_v17  ;;  %2440 = vst [vmem:[#allocation23_spill] sm:$0xff] %v1719_v44  ;;  %v1721_v2 = vcvt.s32.f32 %v603_v25  ;;  %v816_v6 = vunpack.c.3.s8 %v812_v50 }
  0x9b   :  { %v1737_v42 = vcvt.s32.f32 %v621_v43  ;;  %v1744_v25 = vcvt.s32.f32 %v814_v7 }
  0x9c   :  { %v737_v52 = vpop.permute.xlu0 %736  ;;  %v742_v53 = vpop.permute.xlu1 %741  ;;  %2441 = vst [vmem:[#allocation24_spill] sm:$0xff] %v1721_v2  ;;  %v1727_v17 = vcvt.s32.f32 %v611_v34 }
  0x9d   :  { %v1640_v31 = vadd.f32 %v1562_v47, %v737_v52  ;;  %v1648_v35 = vadd.f32 %v1562_v47, %v742_v53  ;;  %v1668_v52 = vld [vmem:[%s2382_s5 + $0x10] sm:$0xff]  ;;  %2448 = vst [vmem:[#allocation31_spill] sm:$0xff] %v1737_v42 }
  0x9e   :  { %v823_v11 = vunpack.c.1.s8 %v1668_v52  ;;  %2444 = vst [vmem:[#allocation27_spill] sm:$0xff] %v1727_v17  ;;  %v822_v33 = vunpack.c.0.s8 %v1668_v52  ;;  %v825_v7 = vunpack.c.3.s8 %v1668_v52 }
  0xa0   :  { %v949_v12 = vpop.permute.xlu0 %948  ;;  %v954_v13 = vpop.permute.xlu1 %953  ;;  %v1760_v43 = vcvt.s32.f32 %v823_v11  ;;  %v1768_v11 = vcvt.s32.f32 %v822_v33 }
  0xa1   :  { %v1671_v53 = vadd.f32 %v1562_v47, %v949_v12  ;;  %v1674_v54 = vadd.f32 %v1562_v47, %v954_v13  ;;  %v1698_v12 = vcvt.s32.f32 %v591_v45  ;;  %v1700_v13 = vcvt.s32.f32 %v592_v46 }
  0xa2   :  { %v1715_v45 = vcvt.s32.f32 %v600_v19  ;;  %v1717_v46 = vcvt.s32.f32 %v601_v20  ;;  %2450 = vst [vmem:[#allocation33_spill] sm:$0xff] %v1768_v11 }
  0xa3   :  { %2435 = vst [vmem:[#allocation18_spill] sm:$0xff] %v1698_v12  ;;  %2436 = vst [vmem:[#allocation19_spill] sm:$0xff] %v1700_v13  ;;  %v682_v34 = vadd.f32 %v1700_v13, %v1698_v12  ;;  %v706_v13 = vadd.f32 %v1725_v27, %v1723_v3  ;;  %v1034_v27 = vld [vmem:[%s2381_s4 + $0x18] sm:$0xff]  ;;  %v1775_v3 = vcvt.s32.f32 %v825_v7 }
  0xa4   :  { %v959_v39 = vpop.permute.xlu0 %958  ;;  %v964_v40 = vpop.permute.xlu1 %963  ;;  %2438 = vst [vmem:[#allocation21_spill] sm:$0xff] %v1715_v45  ;;  %2439 = vst [vmem:[#allocation22_spill] sm:$0xff] %v1717_v46  ;;  %v694_v37 = vadd.f32 %v1717_v46, %v1715_v45 }
  0xa5   :  { %v1683_v58 = vadd.f32 %v1562_v47, %v959_v39  ;;  %v1686_v59 = vadd.f32 %v1562_v47, %v964_v40  ;;  %v1702_v47 = vcvt.s32.f32 %v593_v48  ;;  %v619_v39 = vunpack.c.1.s8 %v617_v21 }
  0xa6   :  { %v620_v40 = vunpack.c.2.s8 %v617_v21  ;;  %v813_v48 = vunpack.c.0.s8 %v812_v50  ;;  %v1731_v21 = vcvt.s32.f32 %v618_v38  ;;  %v830_v50 = vld [vmem:[%s2383_s6 + $0x10] sm:$0xff]  ;;  %v1753_v38 = vcvt.s32.f32 %v816_v6 }
  0xa7   :  { %2437 = vst [vmem:[#allocation20_spill] sm:$0xff] %v1702_v47  ;;  %v1733_v19 = vcvt.s32.f32 %v619_v39  ;;  %v824_v39 = vunpack.c.2.s8 %v1668_v52  ;;  %v832_v49 = vunpack.c.1.s8 %v830_v50  ;;  %v833_v6 = vunpack.c.2.s8 %v830_v50 }
  0xa8   :  { %2445 = vst [vmem:[#allocation28_spill] sm:$0xff] %v1731_v21  ;;  %v1735_v20 = vcvt.s32.f32 %v620_v40  ;;  %v1742_v24 = vcvt.s32.f32 %v813_v48  ;;  %v839_v40 = vld [vmem:[%s2384_s7 + $0x10] sm:$0xff]  ;;  %v831_v48 = vunpack.c.0.s8 %v830_v50  ;;  %v834_v45 = vunpack.c.3.s8 %v830_v50 }
  0xa9   :  { %2446 = vst [vmem:[#allocation29_spill] sm:$0xff] %v1733_v19  ;;  %v718_v46 = vadd.f32 %v1733_v19, %v1731_v21  ;;  %v840_v12 = vunpack.c.0.s8 %v839_v40  ;;  %v841_v18 = vunpack.c.1.s8 %v839_v40  ;;  %v842_v41 = vunpack.c.2.s8 %v839_v40 }
  0xaa   :  { %2447 = vst [vmem:[#allocation30_spill] sm:$0xff] %v1735_v20  ;;  %2449 = vst [vmem:[#allocation32_spill] sm:$0xff] %v1742_v24  ;;  %v843_v36 = vunpack.c.3.s8 %v839_v40  ;;  %v683_v28 = vadd.f32 %v682_v34, %v1702_v47  ;;  %v695_v52 = vadd.f32 %v694_v37, %v1719_v44  ;;  %v1770_v15 = vcvt.s32.f32 %v824_v39 }
  0xab   :  { %v1777_v19 = vcvt.s32.f32 %v831_v48  ;;  %v1779_v50 = vcvt.s32.f32 %v832_v49  ;;  %v1035_v21 = vunpack.c.0.s8 %v1034_v27  ;;  %v707_v40 = vadd.f32 %v706_v13, %v1727_v17 }
  0xac   :  { %v719_v34 = vadd.f32 %v718_v46, %v1735_v20  ;;  %v1783_v37 = vcvt.s32.f32 %v833_v6  ;;  %v1785_v33 = vcvt.s32.f32 %v834_v45  ;;  %v1787_v39 = vcvt.s32.f32 %v840_v12 }
  0xad   :  { %v1789_v44 = vcvt.s32.f32 %v841_v18  ;;  %v1791_v47 = vcvt.s32.f32 %v842_v41  ;;  %v1793_v7 = vcvt.s32.f32 %v843_v36  ;;  %v684_v9 = vadd.f32 %v683_v28, %v1704_v14 }
  0xae   :  { %v696_v13 = vadd.f32 %v695_v52, %v1721_v2  ;;  %v1036_v17 = vunpack.c.1.s8 %v1034_v27  ;;  %v1037_v46 = vunpack.c.2.s8 %v1034_v27  ;;  %v1038_v45 = vunpack.c.3.s8 %v1034_v27 }
  0xaf   :  { %v1797_v8 = vcvt.s32.f32 %v1035_v21  ;;  %v708_v41 = vadd.f32 %v707_v40, %v1729_v22  ;;  %v720_v36 = vadd.f32 %v719_v34, %v1737_v42  ;;  %v904_v29 = vadd.f32 %v1744_v25, %v1742_v24 }
  0xb0   :  { %v916_v28 = vadd.f32 %v1760_v43, %v1768_v11  ;;  %v686_v2 = vadd.f32 %v684_v9, %v1677_v56  ;;  %v1809_v40 = vadd.f32 %v696_v13, %v1680_v57  ;;  %v1811_v34 = vcvt.s32.f32 %v1036_v17 }
  0xb1   :  { %2451 = vst [vmem:[#allocation34_spill] sm:$0xff] %v1797_v8  ;;  %v1813_v42 = vcvt.s32.f32 %v1037_v46  ;;  %v1822_v9 = vadd.f32 %v708_v41, %v1689_v63  ;;  %v1825_v56 = vadd.f32 %v720_v36, %v1713_v23  ;;  %v905_v57 = vadd.f32 %v904_v29, %v1746_v32 }
  0xb2   :  { %v917_v17 = vadd.f32 %v916_v28, %v1770_v15  ;;  %v940_v23 = vadd.f32 %v1789_v44, %v1787_v39  ;;  %v1840_v13 = vcvt.s32.f32 %v1038_v45 }
  0xb4   :  { %2452 = vst [vmem:[#allocation35_spill] sm:$0xff] %v1840_v13 }
  0xcb   :  { %v1231_v48 = vpop.f32.mrf.mxu0  ;;  %v1243_v49 = vpop.f32.mrf.mxu1 }
  0xcc   :  { %v305_v6 = vmul.f32 2.0, %v1231_v48  ;;  %v749_v20 = vmul.f32 2.0, %v1243_v49 }
  0xcd   :  { %v178_v12 = vpop.f32.mrf.mxu0  ;;  %v218_v18 = vpop.f32.mrf.mxu1 }
  0xce   :  { %v309_v52 = vsub.f32 %v1585_v60, %v305_v6  ;;  %v753_v48 = vsub.f32 %v1637_v30, %v749_v20  ;;  %v304_v49 = vmul.f32 2.0, %v178_v12  ;;  %v748_v27 = vmul.f32 2.0, %v218_v18 }
  0xcf   :  { %v1234_v21 = vpop.f32.mrf.mxu0  ;;  %v1246_v8 = vpop.f32.mrf.mxu1 }
  0xd0   :  { %v1815_v24 = vmax.f32 %v309_v52, 0.0  ;;  %v1817_v11 = vmax.f32 %v753_v48, 0.0  ;;  %v308_v60 = vsub.f32 %v1574_v51, %v304_v49  ;;  %v752_v30 = vsub.f32 %v1628_v26, %v748_v27 }
  0xd1   :  { %v307_v20 = vmul.f32 2.0, %v1234_v21  ;;  %v751_v6 = vmul.f32 2.0, %v1246_v8  ;;  %v188_v12 = vpop.f32.mrf.mxu0  ;;  %v228_v18 = vpop.f32.mrf.mxu1  ;;  %v928_v51 = vadd.f32 %v1779_v50, %v1777_v19  ;;  %v1835_v8 = vld [vmem:[%s2382_s5 + $0x18] sm:$0xff]  ;;  %v906_v21 = vadd.f32 %v905_v57, %v1753_v38 }
  0xd2   :  { %1268 = vrsqrt.f32 %v1815_v24  ;;  %v1044_v29 = vunpack.c.0.s8 %v1835_v8  ;;  %v1843_v46 = vmax.f32 %v308_v60, 0.0  ;;  %v1845_v41 = vmax.f32 %v752_v30, 0.0 }
  0xd3   :  { %1270 = vrsqrt.f32 %v1817_v11  ;;  %v1237_v26 = vpop.f32.mrf.mxu0  ;;  %v1249_v63 = vpop.f32.mrf.mxu1  ;;  %v311_v36 = vsub.f32 %v1588_v61, %v307_v20  ;;  %v755_v28 = vsub.f32 %v1648_v35, %v751_v6  ;;  %v306_v52 = vmul.f32 2.0, %v188_v12 }
  0xd4   :  { %v750_v48 = vmul.f32 2.0, %v228_v18  ;;  %v527_v49 = vmul.f32 2.0, %v1237_v26  ;;  %v971_v27 = vmul.f32 2.0, %v1249_v63  ;;  %1272 = vrsqrt.f32 %v1843_v46 }
  0xd5   :  { %v929_v45 = vadd.f32 %v928_v51, %v1783_v37  ;;  %1274 = vrsqrt.f32 %v1845_v41  ;;  %v198_v60 = vpop.f32.mrf.mxu0  ;;  %v1855_v30 = vadd.f32 %v917_v17, %v1775_v3  ;;  %v1858_v61 = vadd.f32 %v940_v23, %v1791_v47  ;;  %v238_v57 = vpop.f32.mrf.mxu1 }
  0xd6   :  { %v1861_v20 = vmax.f32 %v311_v36, 0.0  ;;  %v1863_v6 = vmax.f32 %v755_v28, 0.0  ;;  %v310_v12 = vsub.f32 %v1577_v55, %v306_v52  ;;  %v754_v18 = vsub.f32 %v1640_v31, %v750_v48 }
  0xd7   :  { %v531_v51 = vsub.f32 %v1594_v0, %v527_v49  ;;  %v975_v26 = vsub.f32 %v1674_v54, %v971_v27  ;;  %v1870_v63 = vcvt.s32.f32 %v1044_v29  ;;  %v526_v23 = vmul.f32 2.0, %v198_v60 }
  0xd8   :  { %1276 = vrsqrt.f32 %v1861_v20  ;;  %v1873_v36 = vadd.f32 %v906_v21, %v686_v2  ;;  %v1876_v28 = vadd.f32 %v929_v45, %v1785_v33  ;;  %vm325_vm1 = vcmp.eq.f32.partialorder %v1815_v24, inf  ;;  %v1240_v45 = vpop.f32.mrf.mxu0 }
  0xd9   :  { %vm327_vm2 = vcmp.eq.f32.partialorder %v1815_v24, 0.0  ;;  %1278 = vrsqrt.f32 %v1863_v6  ;;  %v970_v55 = vmul.f32 2.0, %v238_v57  ;;  %v328_v0 = vand.u32 2147483648, %v1815_v24 }
  0xda   :  { %2453 = vst [vmem:[#allocation36_spill] sm:$0xff] %v1873_v36  ;;  %v1882_v31 = vmax.f32 %v310_v12, 0.0  ;;  %v1884_v54 = vmax.f32 %v754_v18, 0.0  ;;  %v1886_v29 = vmax.f32 %v531_v51, 0.0  ;;  %vm769_vm3 = vcmp.eq.f32.partialorder %v1817_v11, inf }
  0xdb   :  { %vm771_vm4 = vcmp.eq.f32.partialorder %v1817_v11, 0.0  ;;  %v772_v2 = vand.u32 2147483648, %v1817_v11  ;;  %v1891_v52 = vmax.f32 %v975_v26, 0.0  ;;  %vm318_vm5 = vcmp.eq.f32.partialorder %v1843_v46, inf }
  0xdc   :  { %vm320_vm6 = vcmp.eq.f32.partialorder %v1843_v46, 0.0  ;;  %1280 = vrsqrt.f32 %v1882_v31  ;;  %v530_v48 = vsub.f32 %v1591_v62, %v526_v23  ;;  %v321_v27 = vand.u32 2147483648, %v1843_v46  ;;  %v1252_v62 = vpop.f32.mrf.mxu1 }
  0xdd   :  { %vm762_vm7 = vcmp.eq.f32.partialorder %v1845_v41, inf  ;;  %1282 = vrsqrt.f32 %v1884_v54  ;;  %v974_v21 = vsub.f32 %v1671_v53, %v970_v55  ;;  %vm764_vm8 = vcmp.eq.f32.partialorder %v1845_v41, 0.0 }
  0xde   :  { %v765_v18 = vand.u32 2147483648, %v1845_v41  ;;  %1284 = vrsqrt.f32 %v1886_v29  ;;  %vm339_vm9 = vcmp.eq.f32.partialorder %v1861_v20, inf  ;;  %v342_v51 = vand.u32 2147483648, %v1861_v20 }
  0xdf   :  { %v1269_v49 = vpop.eup %1268  ;;  %1286 = vrsqrt.f32 %v1891_v52  ;;  %vm341_vm10 = vcmp.eq.f32.partialorder %v1861_v20, 0.0  ;;  %vm783_vm11 = vcmp.eq.f32.partialorder %v1863_v6, inf  ;;  %v786_v26 = vand.u32 2147483648, %v1863_v6 }
  0xe0   :  { %v1271_v60 = vpop.eup %1270  ;;  %v324_v12 = vmul.f32 %v1269_v49, %v1815_v24  ;;  %v1915_v23 = vmax.f32 %v530_v48, 0.0  ;;  %v529_v55 = vmul.f32 2.0, %v1240_v45  ;;  %vm785_vm12 = vcmp.eq.f32.partialorder %v1863_v6, 0.0 }
  0xe1   :  { %v768_v57 = vmul.f32 %v1271_v60, %v1817_v11  ;;  %v1273_v49 = vpop.eup %1272  ;;  %v1925_v35 = vmul.f32 2.0, %v1252_v62  ;;  %vm332_vm13 = vcmp.eq.f32.partialorder %v1882_v31, inf  ;;  %vm334_vm14 = vcmp.eq.f32.partialorder %v1882_v31, 0.0 }
  0xe2   :  { %v326_v53 = vsel %vm325_vm1, %v1815_v24, %v324_v12  ;;  %v1923_v12 = vmax.f32 %v974_v21, 0.0  ;;  %v1275_v13 = vpop.eup %1274  ;;  %v317_v45 = vmul.f32 %v1273_v49, %v1843_v46  ;;  %1288 = vrsqrt.f32 %v1915_v23 }
  0xe3   :  { %v329_v60 = vsel %vm327_vm2, %v328_v0, %v326_v53  ;;  %v770_v17 = vsel %vm769_vm3, %v1817_v11, %v768_v57  ;;  %v761_v0 = vmul.f32 %v1275_v13, %v1845_v41  ;;  %v335_v57 = vand.u32 2147483648, %v1882_v31 }
  0xe4   :  { %v345_v36 = vmul.f32 -0.5, %v329_v60  ;;  %v773_v48 = vsel %vm771_vm4, %v772_v2, %v770_v17  ;;  %v779_v21 = vand.u32 2147483648, %v1884_v54  ;;  %v319_v53 = vsel %vm318_vm5, %v1843_v46, %v317_v45 }
  0xe5   :  { %v789_v24 = vmul.f32 -0.5, %v773_v48  ;;  %vm776_vm15 = vcmp.eq.f32.partialorder %v1884_v54, inf  ;;  %1290 = vrsqrt.f32 %v1923_v12  ;;  %v533_v11 = vsub.f32 %v1600_v4, %v529_v55  ;;  %v1277_v13 = vpop.eup %1276 }
  0xe6   :  { %v350_v62 = vmul.f32 1.442695, %v345_v36  ;;  %v322_v2 = vsel %vm320_vm6, %v321_v27, %v319_v53  ;;  %v763_v36 = vsel %vm762_vm7, %v1845_v41, %v761_v0  ;;  %vm778_vm0 = vcmp.eq.f32.partialorder %v1884_v54, 0.0  ;;  %v1279_v60 = vpop.eup %1278 }
  0xe7   :  { %v794_v17 = vmul.f32 1.442695, %v789_v24  ;;  %vm547_vm1 = vcmp.eq.f32.partialorder %v1886_v29, inf  ;;  %v550_v49 = vand.u32 2147483648, %v1886_v29  ;;  %v344_v48 = vmul.f32 -0.5, %v322_v2 }
  0xe8   :  { %1292 = vpow2.f32 %v350_v62  ;;  %v766_v4 = vsel %vm764_vm8, %v765_v18, %v763_v36  ;;  %v338_v55 = vmul.f32 %v1277_v13, %v1861_v20  ;;  %vm549_vm2 = vcmp.eq.f32.partialorder %v1886_v29, 0.0 }
  0xe9   :  { %vm991_vm3 = vcmp.eq.f32.partialorder %v1891_v52, inf  ;;  %1294 = vpow2.f32 %v794_v17  ;;  %v788_v46 = vmul.f32 -0.5, %v766_v4  ;;  %v782_v27 = vmul.f32 %v1279_v60, %v1863_v6  ;;  %v1281_v0 = vpop.eup %1280 }
  0xea   :  { %vm993_vm4 = vcmp.eq.f32.partialorder %v1891_v52, 0.0  ;;  %v348_v45 = vmul.f32 1.442695, %v344_v48  ;;  %v340_v24 = vsel %vm339_vm9, %v1861_v20, %v338_v55  ;;  %v994_v41 = vand.u32 2147483648, %v1891_v52  ;;  %v1283_v2 = vpop.eup %1282 }
  0xeb   :  { %v1961_v18 = vmax.f32 %v533_v11, 0.0  ;;  %v792_v62 = vmul.f32 1.442695, %v788_v46  ;;  %v343_v53 = vsel %vm341_vm10, %v342_v51, %v340_v24  ;;  %v784_v13 = vsel %vm783_vm11, %v1863_v6, %v782_v27  ;;  %v1285_v20 = vpop.eup %1284 }
  0xec   :  { %vm540_vm5 = vcmp.eq.f32.partialorder %v1915_v23, inf  ;;  %v543_v17 = vand.u32 2147483648, %v1915_v23  ;;  %1296 = vpow2.f32 %v348_v45  ;;  %v347_v36 = vmul.f32 -0.5, %v343_v53  ;;  %v1287_v55 = vpop.eup %1286 }
  0xed   :  { %v787_v11 = vsel %vm785_vm12, %v786_v26, %v784_v13  ;;  %v331_v60 = vmul.f32 %v1281_v0, %v1882_v31  ;;  %vm542_vm6 = vcmp.eq.f32.partialorder %v1915_v23, 0.0  ;;  %1298 = vpow2.f32 %v792_v62 }
  0xee   :  { %v791_v51 = vmul.f32 -0.5, %v787_v11  ;;  %v775_v48 = vmul.f32 %v1283_v2, %v1884_v54  ;;  %vm984_vm7 = vcmp.eq.f32.partialorder %v1923_v12, inf  ;;  %v977_v4 = vsub.f32 %v1686_v59, %v1925_v35 }
  0xef   :  { %v354_v46 = vmul.f32 1.442695, %v347_v36  ;;  %v333_v6 = vsel %vm332_vm13, %v1882_v31, %v331_v60  ;;  %v546_v26 = vmul.f32 %v1285_v20, %v1886_v29  ;;  %1300 = vrsqrt.f32 %v1961_v18  ;;  %v1289_v53 = vpop.eup %1288 }
  0xf0   :  { %v798_v27 = vmul.f32 1.442695, %v791_v51  ;;  %v336_v45 = vsel %vm334_vm14, %v335_v57, %v333_v6  ;;  %v777_v24 = vsel %vm776_vm15, %v1884_v54, %v775_v48  ;;  %v990_v59 = vmul.f32 %v1287_v55, %v1891_v52 }
  0xf1   :  { %1302 = vpow2.f32 %v354_v46  ;;  %v346_v35 = vmul.f32 -0.5, %v336_v45  ;;  %v780_v0 = vsel %vm778_vm0, %v779_v21, %v777_v24  ;;  %v548_v62 = vsel %vm547_vm1, %v1886_v29, %v546_v26  ;;  %v208_v24 = vpop.f32.mrf.mxu0 }
  0xf2   :  { %1304 = vpow2.f32 %v798_v27  ;;  %v790_v13 = vmul.f32 -0.5, %v780_v0  ;;  %v551_v31 = vsel %vm549_vm2, %v550_v49, %v548_v62  ;;  %v992_v57 = vsel %vm991_vm3, %v1891_v52, %v990_v59  ;;  %v1291_v11 = vpop.eup %1290  ;;  %v248_v0 = vpop.f32.mrf.mxu1 }
  0xf3   :  { %v352_v2 = vmul.f32 1.442695, %v346_v35  ;;  %v567_v36 = vmul.f32 -0.5, %v551_v31  ;;  %v995_v54 = vsel %vm993_vm4, %v994_v41, %v992_v57  ;;  %v539_v21 = vmul.f32 %v1289_v53, %v1915_v23 }
  0xf4   :  { %v796_v60 = vmul.f32 1.442695, %v790_v13  ;;  %v1011_v20 = vmul.f32 -0.5, %v995_v54  ;;  %vm986_vm8 = vcmp.eq.f32.partialorder %v1923_v12, 0.0  ;;  %v987_v51 = vand.u32 2147483648, %v1923_v12 }
  0xf5   :  { %1306 = vpow2.f32 %v352_v2  ;;  %v572_v29 = vmul.f32 1.442695, %v567_v36  ;;  %v541_v49 = vsel %vm540_vm5, %v1915_v23, %v539_v21  ;;  %v983_v48 = vmul.f32 %v1291_v11, %v1923_v12  ;;  %v1293_v55 = vpop.eup %1292 }
  0xf6   :  { %1308 = vpow2.f32 %v796_v60  ;;  %v1016_v52 = vmul.f32 1.442695, %v1011_v20  ;;  %v544_v41 = vsel %vm542_vm6, %v543_v17, %v541_v49  ;;  %v2010_v46 = vmax.f32 %v977_v4, 0.0  ;;  %v1295_v6 = vpop.eup %1294 }
  0xf7   :  { %v357_v26 = vsub.f32 0.0, %v1293_v55  ;;  %1310 = vpow2.f32 %v572_v29  ;;  %v566_v27 = vmul.f32 -0.5, %v544_v41  ;;  %v985_v45 = vsel %vm984_vm7, %v1923_v12, %v983_v48 }
  0xf8   :  { %v801_v59 = vsub.f32 0.0, %v1295_v6  ;;  %1312 = vpow2.f32 %v1016_v52  ;;  %v988_v35 = vsel %vm986_vm8, %v987_v51, %v985_v45  ;;  %v2019_v23 = vadd.f32 %v1855_v30, %v1809_v40 }
  0xf9   :  { %v362_v17 = vmul.f32 1.442695, %v357_v26  ;;  %v570_v4 = vmul.f32 1.442695, %v566_v27  ;;  %v1010_v62 = vmul.f32 -0.5, %v988_v35  ;;  %1314 = vrsqrt.f32 %v2010_v46  ;;  %v1297_v53 = vpop.eup %1296 }
  0xfa   :  { %2454 = vst [vmem:[#allocation37_spill] sm:$0xff] %v2019_v23  ;;  %v806_v13 = vmul.f32 1.442695, %v801_v59  ;;  %v528_v31 = vmul.f32 2.0, %v208_v24  ;;  %v2024_v57 = vadd.f32 %v1876_v28, %v1822_v9  ;;  %v942_v12 = vadd.f32 %v1858_v61, %v1793_v7  ;;  %v1299_v2 = vpop.eup %1298 }
  0xfb   :  { %1316 = vpow2.f32 %v362_v17  ;;  %v356_v36 = vsub.f32 0.0, %v1297_v53  ;;  %v1014_v40 = vmul.f32 1.442695, %v1010_v62  ;;  %v972_v30 = vmul.f32 2.0, %v248_v0  ;;  %v2054_v17 = vld [vmem:[%s2383_s6 + $0x18] sm:$0xff] }
  0xfc   :  { %2455 = vst [vmem:[#allocation38_spill] sm:$0xff] %v2024_v57  ;;  %v1301_v54 = vpop.eup %1300  ;;  %1318 = vpow2.f32 %v806_v13  ;;  %v800_v21 = vsub.f32 0.0, %v1299_v2  ;;  %vm561_vm9 = vcmp.eq.f32.partialorder %v1961_v18, inf  ;;  %v532_v11 = vsub.f32 %v1597_v1, %v528_v31  ;;  %v2474_v57 = vld [vmem:[#allocation9_spill] sm:$0xff] }
  0xfd   :  { %v360_v60 = vmul.f32 1.442695, %v356_v36  ;;  %1320 = vpow2.f32 %v570_v4  ;;  %v560_v9 = vmul.f32 %v1301_v54, %v1961_v18  ;;  %v976_v28 = vsub.f32 %v1683_v58, %v972_v30 }
  0xfe   :  { %v1303_v20 = vpop.eup %1302  ;;  %1322 = vpow2.f32 %v1014_v40  ;;  %vm563_vm10 = vcmp.eq.f32.partialorder %v1961_v18, 0.0  ;;  %v564_v61 = vand.u32 2147483648, %v1961_v18  ;;  %v2034_v51 = vmax.f32 %v532_v11, 0.0 }
  0xff   :  { %v1305_v29 = vpop.eup %1304  ;;  %1324 = vpow2.f32 %v360_v60  ;;  %v359_v49 = vsub.f32 0.0, %v1303_v20  ;;  %v562_v48 = vsel %vm561_vm9, %v1961_v18, %v560_v9  ;;  %v2037_v1 = vmax.f32 %v976_v28, 0.0 }
 0x100   :  { %v804_v55 = vmul.f32 1.442695, %v800_v21  ;;  %v803_v52 = vsub.f32 0.0, %v1305_v29  ;;  %v565_v41 = vsel %vm563_vm10, %v564_v61, %v562_v48  ;;  %v2040_v58 = vadd.f32 %v942_v12, %v1825_v56 }
 0x101   :  { %v366_v6 = vmul.f32 1.442695, %v359_v49  ;;  %v569_v26 = vmul.f32 -0.5, %v565_v41  ;;  %vm1005_vm11 = vcmp.eq.f32.partialorder %v2010_v46, inf  ;;  %1326 = vrsqrt.f32 %v2034_v51 }
 0x102   :  { %2456 = vst [vmem:[#allocation39_spill] sm:$0xff] %v2040_v58  ;;  %v1307_v27 = vpop.eup %1306  ;;  %v810_v45 = vmul.f32 1.442695, %v803_v52  ;;  %vm1007_vm12 = vcmp.eq.f32.partialorder %v2010_v46, 0.0  ;;  %v1008_v18 = vand.u32 2147483648, %v2010_v46  ;;  %1328 = vrsqrt.f32 %v2037_v1 }
 0x103   :  { %v1309_v24 = vpop.eup %1308  ;;  %1330 = vpow2.f32 %v366_v6  ;;  %v358_v59 = vsub.f32 0.0, %v1307_v27  ;;  %v576_v35 = vmul.f32 1.442695, %v569_v26  ;;  %v2457_v56 = vunpack.c.1.s8 %v1835_v8 }
 0x104   :  { %v1311_v4 = vpop.eup %1310  ;;  %1332 = vpow2.f32 %v804_v55  ;;  %v802_v62 = vsub.f32 0.0, %v1309_v24  ;;  %v557_v53 = vand.u32 2147483648, %v2034_v51  ;;  %v2459_v13 = vunpack.c.2.s8 %v1835_v8 }
 0x105   :  { %v2049_v0 = vcvt.s32.f32 %v2457_v56  ;;  %v1313_v12 = vpop.eup %1312  ;;  %v364_v2 = vmul.f32 1.442695, %v358_v59  ;;  %v579_v36 = vsub.f32 0.0, %v1311_v4  ;;  %1334 = vpow2.f32 %v576_v35 }
 0x106   :  { %v2059_v31 = vcvt.s32.f32 %v2459_v13  ;;  %v1053_v40 = vunpack.c.0.s8 %v2054_v17  ;;  %v1315_v30 = vpop.eup %1314  ;;  %1336 = vpow2.f32 %v810_v45  ;;  %v808_v54 = vmul.f32 1.442695, %v802_v62  ;;  %v2465_v13 = vld [vmem:[#allocation12_spill] sm:$0xff] }
 0x107   :  { %2458 = vst [vmem:[#allocation40_spill] sm:$0xff] %v2049_v0  ;;  %v1023_v21 = vsub.f32 0.0, %v1313_v12  ;;  %v1054_v11 = vunpack.c.1.s8 %v2054_v17  ;;  %1338 = vpow2.f32 %v364_v2  ;;  %v584_v60 = vmul.f32 1.442695, %v579_v36  ;;  %v2466_v36 = vld [vmem:[#allocation5_spill] sm:$0xff] }
 0x108   :  { %2460 = vst [vmem:[#allocation41_spill] sm:$0xff] %v2059_v31  ;;  %v1004_v9 = vmul.f32 %v1315_v30, %v2010_v46  ;;  %v1001_v28 = vand.u32 2147483648, %v2037_v1  ;;  %v1317_v20 = vpop.eup %1316  ;;  %vm554_vm13 = vcmp.eq.f32.partialorder %v2034_v51, inf  ;;  %v2461_v29 = vunpack.c.3.s8 %v1835_v8 }
 0x109   :  { %v1028_v61 = vmul.f32 1.442695, %v1023_v21  ;;  %v2072_v52 = vpop.eup %1318  ;;  %1340 = vpow2.f32 %v808_v54  ;;  %vm556_vm14 = vcmp.eq.f32.partialorder %v2034_v51, 0.0  ;;  %vm998_vm15 = vcmp.eq.f32.partialorder %v2037_v1, inf }
 0x10a   :  { %v2068_v49 = vcvt.s32.f32 %v2461_v29  ;;  %v1006_v41 = vsel %vm1005_vm11, %v2010_v46, %v1004_v9  ;;  %v405_v6 = vmul.f32 %v1317_v20, %v1602_v5  ;;  %v2080_v8 = vcvt.s32.f32 %v1053_v40  ;;  %v1321_v26 = vpop.eup %1320 }
 0x10b   :  { %1342 = vpow2.f32 %v584_v60  ;;  %v1009_v27 = vsel %vm1007_vm12, %v1008_v18, %v1006_v41  ;;  %vm1000_vm0 = vcmp.eq.f32.partialorder %v2037_v1, 0.0  ;;  %v2086_v45 = vmul.f32 %v1317_v20, %v1609_v10  ;;  %v1323_v59 = vpop.eup %1322  ;;  %v2468_v41 = vld [vmem:[#allocation7_spill] sm:$0xff] }
 0x10c   :  { %2462 = vst [vmem:[#allocation42_spill] sm:$0xff] %v2068_v49  ;;  %2463 = vst [vmem:[#allocation43_spill] sm:$0xff] %v2080_v8  ;;  %v2088_v24 = vcvt.s32.f32 %v1054_v11  ;;  %1344 = vpow2.f32 %v1028_v61  ;;  %v578_v35 = vsub.f32 0.0, %v1321_v26  ;;  %v1013_v56 = vmul.f32 -0.5, %v1009_v27  ;;  %v1325_v4 = vpop.eup %1324  ;;  %v2467_v61 = vld [vmem:[#allocation6_spill] sm:$0xff] }
 0x10d   :  { %v2091_v5 = vmul.f32 %v1317_v20, %v1613_v16  ;;  %v1022_v62 = vsub.f32 0.0, %v1323_v59  ;;  %v2094_v12 = vmul.f32 %v1317_v20, %v2465_v13  ;;  %v421_v46 = vsub.f32 2.0, %v1317_v20 }
 0x10e   :  { %2464 = vst [vmem:[#allocation44_spill] sm:$0xff] %v2088_v24  ;;  %v2096_v18 = vmul.f32 %v1317_v20, %v405_v6  ;;  %v582_v2 = vmul.f32 1.442695, %v578_v35  ;;  %v1020_v10 = vmul.f32 1.442695, %v1013_v56  ;;  %v404_v40 = vmul.f32 %v1325_v4, %v2466_v36  ;;  %v1327_v54 = vpop.eup %1326  ;;  %v2469_v56 = vld [vmem:[#allocation11_spill] sm:$0xff] }
 0x10f   :  { %v2101_v30 = vmul.f32 %v2072_v52, %v1744_v25  ;;  %v1026_v21 = vmul.f32 1.442695, %v1022_v62  ;;  %v420_v16 = vsub.f32 2.0, %v1325_v4  ;;  %v2105_v11 = vmul.f32 %v2072_v52, %v1760_v43  ;;  %v1329_v9 = vpop.eup %1328 }
 0x110   :  { %v2109_v60 = vmul.f32 %v2072_v52, %v1779_v50  ;;  %1346 = vpow2.f32 %v582_v2  ;;  %v553_v20 = vmul.f32 %v1327_v54, %v2034_v51  ;;  %v408_v29 = vmul.f32 %v1325_v4, %v2467_v61  ;;  %v1331_v26 = vpop.eup %1330  ;;  %v2470_v54 = vld [vmem:[#allocation13_spill] sm:$0xff] }
 0x111   :  { %v412_v25 = vmul.f32 %v1325_v4, %v2468_v41  ;;  %1348 = vpow2.f32 %v1026_v21  ;;  %v997_v27 = vmul.f32 %v1329_v9, %v2037_v1  ;;  %v424_v59 = vmax.f32 %v420_v16, 0.0  ;;  %v2115_v43 = vpop.eup %1332 }
 0x112   :  { %v425_v35 = vmax.f32 %v421_v46, 0.0  ;;  %1350 = vpow2.f32 %v1020_v10  ;;  %v555_v50 = vsel %vm554_vm13, %v2034_v51, %v553_v20  ;;  %v416_v62 = vmul.f32 %v1325_v4, %v2469_v56  ;;  %v1335_v2 = vpop.eup %1334 }
 0x113   :  { %v436_v13 = vmul.f32 %v1325_v4, %v404_v40  ;;  %v558_v36 = vsel %vm556_vm14, %v557_v53, %v555_v50  ;;  %v999_v46 = vsel %vm998_vm15, %v2037_v1, %v997_v27  ;;  %v407_v21 = vmul.f32 %v1331_v26, %v2470_v54  ;;  %v2129_v16 = vpop.eup %1336  ;;  %v2471_v53 = vld [vmem:[#allocation14_spill] sm:$0xff]  ;;  %v2472_v54 = vld [vmem:[#allocation8_spill] sm:$0xff] }
 0x114   :  { %v454_v10 = vadd.f32 %v405_v6, %v404_v40  ;;  %v581_v9 = vsub.f32 0.0, %v1335_v2  ;;  %v568_v20 = vmul.f32 -0.5, %v558_v36  ;;  %v1002_v4 = vsel %vm1000_vm0, %v1001_v28, %v999_v46  ;;  %v1339_v41 = vpop.eup %1338  ;;  %v2473_v40 = vld [vmem:[#allocation15_spill] sm:$0xff]  ;;  %v2475_v1 = vld [vmem:[#allocation10_spill] sm:$0xff] }
 0x115   :  { %v423_v61 = vsub.f32 2.0, %v1331_v26  ;;  %v1012_v51 = vmul.f32 -0.5, %v1002_v4  ;;  %v411_v50 = vmul.f32 %v1331_v26, %v2471_v53  ;;  %v428_v56 = vmul.f32 %v424_v59, %v424_v59 }
 0x116   :  { %v429_v55 = vmul.f32 %v425_v35, %v425_v35  ;;  %v588_v27 = vmul.f32 1.442695, %v581_v9  ;;  %v574_v48 = vmul.f32 1.442695, %v568_v20  ;;  %v406_v6 = vmul.f32 %v1339_v41, %v2472_v54  ;;  %v2138_v2 = vpop.eup %1340  ;;  %v2476_v20 = vld [vmem:[#allocation16_spill] sm:$0xff] }
 0x117   :  { %v415_v58 = vmul.f32 %v1331_v26, %v2473_v40  ;;  %v1018_v36 = vmul.f32 1.442695, %v1012_v51  ;;  %v410_v23 = vmul.f32 %v1339_v41, %v2474_v57  ;;  %v414_v28 = vmul.f32 %v1339_v41, %v2475_v1 }
 0x118   :  { %v422_v46 = vsub.f32 2.0, %v1339_v41  ;;  %v2142_v24 = vpop.eup %1342  ;;  %1352 = vpow2.f32 %v588_v27  ;;  %v427_v4 = vmax.f32 %v423_v61, 0.0  ;;  %v432_v59 = vmul.f32 0.5, %v428_v56 }
 0x119   :  { %v433_v35 = vmul.f32 0.5, %v429_v55  ;;  %v2144_v9 = vpop.eup %1344  ;;  %1354 = vpow2.f32 %v574_v48  ;;  %v418_v53 = vmul.f32 %v1339_v41, %v2476_v20  ;;  %v455_v40 = vadd.f32 %v454_v10, %v406_v6  ;;  %v2477_v55 = vld [vmem:[#allocation17_spill] sm:$0xff] }
 0x11a   :  { %v426_v54 = vmax.f32 %v422_v46, 0.0  ;;  %1356 = vpow2.f32 %v1018_v36  ;;  %v431_v51 = vmul.f32 %v427_v4, %v427_v4  ;;  %v440_v8 = vmul.f32 %v432_v59, %v408_v29 }
 0x11b   :  { %v441_v57 = vmul.f32 %v433_v35, %v2086_v45  ;;  %v2148_v49 = vadd.f32 %v455_v40, %v407_v21  ;;  %v466_v27 = vadd.f32 %v2086_v45, %v408_v29  ;;  %v478_v61 = vadd.f32 %v2091_v5, %v412_v25 }
 0x11c   :  { %v430_v1 = vmul.f32 %v426_v54, %v426_v54  ;;  %v419_v56 = vmul.f32 %v1331_v26, %v2477_v55  ;;  %v435_v31 = vmul.f32 0.5, %v431_v51  ;;  %v444_v48 = vadd.f32 %v440_v8, %v436_v13 }
 0x11d   :  { %v490_v20 = vadd.f32 %v2094_v12, %v416_v62  ;;  %v1347_v46 = vpop.eup %1346  ;;  %v439_v36 = vmul.f32 %v1331_v26, %v407_v21  ;;  %v467_v4 = vadd.f32 %v466_v27, %v410_v23  ;;  %v479_v59 = vadd.f32 %v478_v61, %v414_v28  ;;  %v2478_v26 = vld [vmem:[#allocation18_spill] sm:$0xff] }
 0x11e   :  { %v434_v10 = vmul.f32 0.5, %v430_v1  ;;  %v2154_v0 = vpop.eup %1348  ;;  %v438_v35 = vmul.f32 %v1339_v41, %v406_v6  ;;  %v443_v54 = vmul.f32 %v435_v31, %v411_v50  ;;  %v445_v40 = vadd.f32 %v441_v57, %v2096_v18  ;;  %v2479_v1 = vld [vmem:[#allocation19_spill] sm:$0xff]  ;;  %v2480_v41 = vld [vmem:[#allocation21_spill] sm:$0xff]  ;;  %v2483_v61 = vld [vmem:[#allocation26_spill] sm:$0xff] }
 0x11f   :  { %v491_v45 = vadd.f32 %v490_v20, %v418_v53  ;;  %v1351_v29 = vpop.eup %1350  ;;  %v2157_v25 = vadd.f32 %v467_v4, %v411_v50  ;;  %v2159_v51 = vadd.f32 %v479_v59, %v415_v58  ;;  %v626_v13 = vmul.f32 %v1347_v46, %v2478_v26  ;;  %v2481_v53 = vld [vmem:[#allocation22_spill] sm:$0xff]  ;;  %v2482_v58 = vld [vmem:[#allocation25_spill] sm:$0xff] }
 0x120   :  { %v442_v5 = vmul.f32 %v434_v10, %v410_v23  ;;  %v1025_v8 = vsub.f32 0.0, %v1351_v29  ;;  %v448_v12 = vadd.f32 %v445_v40, %v444_v48  ;;  %v447_v28 = vadd.f32 %v443_v54, %v439_v36  ;;  %v2485_v20 = vld [vmem:[#allocation29_spill] sm:$0xff] }
 0x121   :  { %v2161_v62 = vadd.f32 %v491_v45, %v419_v56  ;;  %v627_v31 = vmul.f32 %v2142_v24, %v2479_v1  ;;  %v630_v18 = vmul.f32 %v1347_v46, %v2480_v41  ;;  %v631_v23 = vmul.f32 %v2142_v24, %v2481_v53  ;;  %v2484_v56 = vld [vmem:[#allocation28_spill] sm:$0xff]  ;;  %v2487_v53 = vld [vmem:[#allocation31_spill] sm:$0xff] }
 0x122   :  { %v446_v21 = vadd.f32 %v442_v5, %v438_v35  ;;  %v1032_v6 = vmul.f32 1.442695, %v1025_v8  ;;  %v634_v57 = vmul.f32 %v1347_v46, %v2482_v58  ;;  %v642_v27 = vsub.f32 2.0, %v1347_v46 }
 0x123   :  { %v635_v55 = vmul.f32 %v2142_v24, %v2483_v61  ;;  %v638_v48 = vmul.f32 %v1347_v46, %v2484_v56  ;;  %v639_v10 = vmul.f32 %v2142_v24, %v2485_v20  ;;  %v643_v36 = vsub.f32 2.0, %v2142_v24 }
 0x124   :  { %v449_v50 = vadd.f32 %v448_v12, %v446_v21  ;;  %1358 = vpow2.f32 %v1032_v6  ;;  %v646_v35 = vmax.f32 %v642_v27, 0.0  ;;  %v658_v54 = vmul.f32 %v1347_v46, %v626_v13  ;;  %v2486_v21 = vld [vmem:[#allocation24_spill] sm:$0xff] }
 0x125   :  { %v1353_v4 = vpop.eup %1352  ;;  %v659_v29 = vmul.f32 %v2142_v24, %v627_v31  ;;  %v2182_v5 = vadd.f32 %v627_v31, %v626_v13  ;;  %v2184_v8 = vadd.f32 %v631_v23, %v630_v18  ;;  %v2196_v56 = vadd.f32 %v635_v55, %v634_v57  ;;  %v2489_v57 = vld [vmem:[#allocation33_spill] sm:$0xff] }
 0x126   :  { %v2176_v59 = vadd.f32 %v449_v50, %v447_v28  ;;  %v1355_v40 = vpop.eup %1354  ;;  %v2179_v45 = vmul.f32 %v1353_v4, %v1704_v14  ;;  %v2187_v1 = vmul.f32 %v1353_v4, %v2486_v21  ;;  %v645_v41 = vsub.f32 2.0, %v1353_v4 }
 0x127   :  { %v1357_v12 = vpop.eup %1356  ;;  %v580_v26 = vsub.f32 0.0, %v1355_v40  ;;  %v647_v28 = vmax.f32 %v643_v36, 0.0  ;;  %v2190_v46 = vmul.f32 %v1353_v4, %v1729_v22  ;;  %v2193_v14 = vmul.f32 %v1353_v4, %v2487_v53 }
 0x128   :  { %v1024_v6 = vsub.f32 0.0, %v1357_v12  ;;  %v650_v50 = vmul.f32 %v646_v35, %v646_v35  ;;  %v649_v13 = vmax.f32 %v645_v41, 0.0  ;;  %v661_v61 = vmul.f32 %v1353_v4, %v2179_v45  ;;  %v2488_v12 = vld [vmem:[#allocation32_spill] sm:$0xff] }
 0x129   :  { %v586_v24 = vmul.f32 1.442695, %v580_v26  ;;  %v651_v31 = vmul.f32 %v647_v28, %v647_v28  ;;  %v2198_v40 = vadd.f32 %v639_v10, %v638_v48  ;;  %v848_v21 = vmul.f32 %v2115_v43, %v2488_v12 }
 0x12a   :  { %v1030_v58 = vmul.f32 1.442695, %v1024_v6  ;;  %v654_v27 = vmul.f32 0.5, %v650_v50  ;;  %v653_v20 = vmul.f32 %v649_v13, %v649_v13  ;;  %v850_v35 = vmul.f32 %v2138_v2, %v1746_v32 }
 0x12b   :  { %1360 = vpow2.f32 %v586_v24  ;;  %v655_v36 = vmul.f32 0.5, %v651_v31  ;;  %v851_v26 = vmul.f32 %v2129_v16, %v1753_v38  ;;  %v852_v55 = vmul.f32 %v2115_v43, %v2489_v57 }
 0x12c   :  { %v662_v22 = vmul.f32 %v654_v27, %v630_v18  ;;  %1362 = vpow2.f32 %v1030_v58  ;;  %v657_v41 = vmul.f32 0.5, %v653_v20  ;;  %v854_v48 = vmul.f32 %v2138_v2, %v1770_v15 }
 0x12d   :  { %v663_v4 = vmul.f32 %v655_v36, %v631_v23  ;;  %v2212_v18 = vmul.f32 %v2129_v16, %v1775_v3  ;;  %v856_v32 = vmul.f32 %v2115_v43, %v1777_v19  ;;  %v858_v38 = vmul.f32 %v2138_v2, %v1783_v37 }
 0x12e   :  { %v666_v28 = vadd.f32 %v662_v22, %v658_v54  ;;  %v665_v10 = vmul.f32 %v657_v41, %v2187_v1  ;;  %v2221_v23 = vmul.f32 %v2129_v16, %v1785_v33  ;;  %v860_v54 = vmul.f32 %v2115_v43, %v1787_v39 }
 0x12f   :  { %v667_v15 = vadd.f32 %v663_v4, %v659_v29  ;;  %v864_v6 = vsub.f32 2.0, %v2115_v43  ;;  %v865_v3 = vsub.f32 2.0, %v2072_v52  ;;  %v866_v53 = vsub.f32 2.0, %v2138_v2 }
 0x130   :  { %v861_v19 = vmul.f32 %v2072_v52, %v1789_v44  ;;  %v862_v37 = vmul.f32 %v2138_v2, %v1791_v47  ;;  %v2234_v33 = vmul.f32 %v2129_v16, %v1793_v7  ;;  %v867_v50 = vsub.f32 2.0, %v2129_v16 }
 0x131   :  { %v2237_v39 = vpop.eup %1358  ;;  %v2239_v29 = vadd.f32 %v665_v10, %v661_v61  ;;  %v868_v24 = vmax.f32 %v864_v6, 0.0  ;;  %v869_v13 = vmax.f32 %v865_v3, 0.0  ;;  %v870_v31 = vmax.f32 %v866_v53, 0.0 }
 0x132   :  { %v2241_v58 = vadd.f32 %v667_v15, %v666_v28  ;;  %v871_v27 = vmax.f32 %v867_v50, 0.0  ;;  %v880_v44 = vmul.f32 %v2115_v43, %v848_v21  ;;  %v898_v47 = vadd.f32 %v2101_v30, %v848_v21 }
 0x133   :  { %v872_v20 = vmul.f32 %v868_v24, %v868_v24  ;;  %v873_v36 = vmul.f32 %v869_v13, %v869_v13  ;;  %v874_v7 = vmul.f32 %v870_v31, %v870_v31  ;;  %v881_v22 = vmul.f32 %v2072_v52, %v2101_v30  ;;  %v2491_v13 = vld [vmem:[#allocation23_spill] sm:$0xff] }
 0x134   :  { %v875_v12 = vmul.f32 %v871_v27, %v871_v27  ;;  %v882_v61 = vmul.f32 %v2138_v2, %v850_v35  ;;  %v899_v41 = vadd.f32 %v898_v47, %v850_v35  ;;  %v910_v4 = vadd.f32 %v2105_v11, %v852_v55  ;;  %v2490_v2 = vld [vmem:[#allocation20_spill] sm:$0xff]  ;;  %v2492_v27 = vld [vmem:[#allocation27_spill] sm:$0xff] }
 0x135   :  { %v876_v57 = vmul.f32 0.5, %v872_v20  ;;  %v877_v28 = vmul.f32 0.5, %v873_v36  ;;  %v878_v10 = vmul.f32 0.5, %v874_v7  ;;  %v883_v15 = vmul.f32 %v2129_v16, %v851_v26  ;;  %v2493_v20 = vld [vmem:[#allocation30_spill] sm:$0xff] }
 0x136   :  { %v879_v43 = vmul.f32 0.5, %v875_v12  ;;  %v911_v6 = vadd.f32 %v910_v4, %v854_v48  ;;  %v922_v21 = vadd.f32 %v2109_v60, %v856_v32  ;;  %v934_v3 = vadd.f32 %v861_v19, %v860_v54 }
 0x137   :  { %v884_v50 = vmul.f32 %v876_v57, %v852_v55  ;;  %v885_v52 = vmul.f32 %v877_v28, %v2105_v11  ;;  %v886_v30 = vmul.f32 %v878_v10, %v854_v48  ;;  %v900_v24 = vadd.f32 %v899_v41, %v851_v26 }
 0x138   :  { %v1361_v53 = vpop.eup %1360  ;;  %v887_v60 = vmul.f32 %v879_v43, %v2212_v18  ;;  %v923_v54 = vadd.f32 %v922_v21, %v858_v38  ;;  %v935_v4 = vadd.f32 %v934_v3, %v862_v37 }
 0x139   :  { %v628_v35 = vmul.f32 %v1361_v53, %v2490_v2  ;;  %v632_v31 = vmul.f32 %v1361_v53, %v2491_v13  ;;  %v636_v47 = vmul.f32 %v1361_v53, %v2492_v27  ;;  %v640_v36 = vmul.f32 %v1361_v53, %v2493_v20  ;;  %v2256_v16 = vpop.eup %1362 }
 0x13a   :  { %v644_v7 = vsub.f32 2.0, %v1361_v53  ;;  %v888_v32 = vadd.f32 %v884_v50, %v880_v44  ;;  %v889_v48 = vadd.f32 %v885_v52, %v881_v22  ;;  %v890_v41 = vadd.f32 %v886_v30, %v882_v61 }
 0x13b   :  { %v677_v55 = vadd.f32 %v2182_v5, %v628_v35  ;;  %v689_v11 = vadd.f32 %v2184_v8, %v632_v31  ;;  %v701_v26 = vadd.f32 %v2196_v56, %v636_v47  ;;  %v713_v12 = vadd.f32 %v2198_v40, %v640_v36 }
 0x13c   :  { %v648_v19 = vmax.f32 %v644_v7, 0.0  ;;  %v892_v44 = vadd.f32 %v889_v48, %v888_v32  ;;  %v891_v43 = vadd.f32 %v887_v60, %v883_v15  ;;  %v912_v8 = vadd.f32 %v911_v6, %v2212_v18  ;;  %v2497_v7 = vld [vmem:[#allocation35_spill] sm:$0xff]  ;;  %v2500_v48 = vld [vmem:[#allocation42_spill] sm:$0xff] }
 0x13d   :  { %v678_v57 = vadd.f32 %v677_v55, %v2179_v45  ;;  %v690_v28 = vadd.f32 %v689_v11, %v2187_v1  ;;  %v702_v10 = vadd.f32 %v701_v26, %v2190_v46  ;;  %v714_v5 = vadd.f32 %v713_v12, %v2193_v14  ;;  %v1061_v45 = vld [vmem:[%s2384_s7 + $0x18] sm:$0xff]  ;;  %v2499_v11 = vld [vmem:[#allocation41_spill] sm:$0xff]  ;;  %s1387_s7 = smov [#allocation2]  }
 0x13e   :  { %v652_v38 = vmul.f32 %v648_v19, %v648_v19  ;;  %v893_v37 = vadd.f32 %v892_v44, %v890_v41  ;;  %v660_v46 = vmul.f32 %v1361_v53, %v628_v35  ;;  %v924_v14 = vadd.f32 %v923_v54, %v2221_v23  ;;  %v2496_v35 = vld [vmem:[#allocation34_spill] sm:$0xff]  ;;  %v2498_v54 = vld [vmem:[#allocation40_spill] sm:$0xff]  ;;  %v2501_v12 = vld [vmem:[#allocation43_spill] sm:$0xff]  ;;  %s1173_s11 = sshll.u32 %s1387_s7, 4  ;;  %s1174_s11 = int_to_ptr.vmem [resolvable:$true] %s1173_s11 }
 0x13f   :  { %v680_v56 = vadd.f32 %v678_v57, %v2148_v49  ;;  %v692_v22 = vadd.f32 %v690_v28, %v2157_v25  ;;  %v704_v40 = vadd.f32 %v702_v10, %v2159_v51  ;;  %v716_v61 = vadd.f32 %v714_v5, %v2161_v62  ;;  %s1364_s12 = scalar_lea.vmem %s1174_s11, 1152  ;;  %p1369_p1 = scmp.lt.s32.totalorder %s1174_s11, %s1174_s11 }
 0x140   :  { %v656_v1 = vmul.f32 0.5, %v652_v38  ;;  %v2276_v15 = vadd.f32 %v893_v37, %v891_v43  ;;  %v936_v18 = vadd.f32 %v935_v4, %v2234_v33  ;;  %v2494_v49 = vunpack.c.2.s8 %v2054_v17  ;;  %v2502_v4 = vld [vmem:[#allocation44_spill] sm:$0xff]  ;;  %p1365_p0 = scmp.ne.s32.totalorder %s1174_s11, %s1364_s12  ;;  %p1370_p2 = scmp.lt.s32.totalorder %s1364_s12, %s1364_s12 }
 0x141   :  { %v2495_v51 = vunpack.c.3.s8 %v2054_v17  ;;  %v2287_v3 = vadd.f32 %v900_v24, %v680_v56  ;;  %v1062_v53 = vunpack.c.0.s8 %v1061_v45  ;;  %v1063_v50 = vunpack.c.1.s8 %v1061_v45 }
 0x142   :  { %v2281_v25 = vcvt.s32.f32 %v2494_v49  ;;  %v664_v21 = vmul.f32 %v656_v1, %v632_v31  ;;  %v2289_v62 = vadd.f32 %v912_v8, %v692_v22  ;;  %v2291_v23 = vadd.f32 %v924_v14, %v704_v40  ;;  %p1371_p3 = por %p1370_p2, %p1369_p1 }
 0x143   :  { %v2285_v6 = vcvt.s32.f32 %v2495_v51  ;;  %v1064_v52 = vunpack.c.2.s8 %v1061_v45  ;;  %v1065_v30 = vunpack.c.3.s8 %v1061_v45  ;;  %v2293_v2 = vadd.f32 %v936_v18, %v716_v61 }
 0x144   :  { %v668_v33 = vadd.f32 %v664_v21, %v660_v46  ;;  %v1070_v13 = vmul.f32 %v2154_v0, %v2496_v35  ;;  %v1071_v17 = vmul.f32 %v2144_v9, %v1811_v34  ;;  %v2299_v31 = vcvt.s32.f32 %v1062_v53  ;;  %p1372_p4 = pnand %p1371_p3, %p1365_p0 }
 0x145   :  { %v2301_v24 = vcvt.s32.f32 %v1063_v50  ;;  %v2303_v27 = vcvt.s32.f32 %v1064_v52  ;;  %v1072_v47 = vmul.f32 %v2256_v16, %v1813_v42  ;;  %v2308_v36 = vcvt.s32.f32 %v1065_v30 }
 0x146   :  { %v671_v20 = vadd.f32 %v2241_v58, %v668_v33  ;;  %v1073_v60 = vmul.f32 %v2237_v39, %v2497_v7  ;;  %v1074_v32 = vmul.f32 %v2154_v0, %v1870_v63  ;;  %v1075_v55 = vmul.f32 %v2144_v9, %v2498_v54 }
 0x147   :  { %v1076_v26 = vmul.f32 %v2256_v16, %v2499_v11  ;;  %v1077_v19 = vmul.f32 %v2237_v39, %v2500_v48  ;;  %v1078_v58 = vmul.f32 %v2154_v0, %v2501_v12  ;;  %v1079_v57 = vmul.f32 %v2144_v9, %v2502_v4 }
 0x148   :  { %v672_v41 = vadd.f32 %v671_v20, %v2239_v29  ;;  %v1080_v28 = vmul.f32 %v2256_v16, %v2281_v25  ;;  %v2329_v10 = vmul.f32 %v2237_v39, %v2285_v6  ;;  %v1082_v44 = vmul.f32 %v2154_v0, %v2299_v31 }
 0x149   :  { %v1086_v38 = vsub.f32 2.0, %v2154_v0  ;;  %v1087_v5 = vsub.f32 2.0, %v2144_v9  ;;  %v1088_v43 = vsub.f32 2.0, %v2256_v16  ;;  %v1083_v8 = vmul.f32 %v2144_v9, %v2301_v24 }
 0x14a   :  { %v674_v29 = vadd.f32 %v672_v41, %v2176_v59  ;;  %v1084_v56 = vmul.f32 %v2256_v16, %v2303_v27  ;;  %v1089_v22 = vsub.f32 2.0, %v2237_v39  ;;  %v1102_v1 = vmul.f32 %v2154_v0, %v1070_v13 }
 0x14b   :  { %v1090_v40 = vmax.f32 %v1086_v38, 0.0  ;;  %v1091_v37 = vmax.f32 %v1087_v5, 0.0  ;;  %v1092_v45 = vmax.f32 %v1088_v43, 0.0  ;;  %v1103_v61 = vmul.f32 %v2144_v9, %v1071_v17 }
 0x14c   :  { %v1093_v46 = vmax.f32 %v1089_v22, 0.0  ;;  %v1104_v14 = vmul.f32 %v2256_v16, %v1072_v47  ;;  %v1120_v18 = vadd.f32 %v1071_v17, %v1070_v13  ;;  %v1126_v21 = vadd.f32 %v1811_v34, %v2496_v35 }
 0x14d   :  { %v1094_v59 = vmul.f32 %v1090_v40, %v1090_v40  ;;  %v1095_v49 = vmul.f32 %v1091_v37, %v1091_v37  ;;  %v1096_v51 = vmul.f32 %v1092_v45, %v1092_v45  ;;  %v1132_v52 = vadd.f32 %v1075_v55, %v1074_v32 }
 0x14e   :  { %v1097_v53 = vmul.f32 %v1093_v46, %v1093_v46  ;;  %v1121_v50 = vadd.f32 %v1120_v18, %v1072_v47  ;;  %v1138_v30 = vadd.f32 %v2498_v54, %v1870_v63  ;;  %v1127_v9 = vadd.f32 %v1126_v21, %v1813_v42  ;;  %v2503_v42 = vld [vmem:[#allocation36_spill] sm:$0xff] }
 0x14f   :  { %v1098_v33 = vmul.f32 0.5, %v1094_v59  ;;  %v1099_v0 = vmul.f32 0.5, %v1095_v49  ;;  %v1100_v20 = vmul.f32 0.5, %v1096_v51  ;;  %v1133_v13 = vadd.f32 %v1132_v52, %v1076_v26 }
 0x150   :  { %v1101_v41 = vmul.f32 0.5, %v1097_v53  ;;  %v1122_v16 = vadd.f32 %v1121_v50, %v1073_v60  ;;  %v1139_v17 = vadd.f32 %v1138_v30, %v2499_v11  ;;  %v1128_v34 = vadd.f32 %v1127_v9, %v2497_v7 }
 0x151   :  { %v1106_v38 = vmul.f32 %v1098_v33, %v1074_v32  ;;  %v1107_v5 = vmul.f32 %v1099_v0, %v1075_v55  ;;  %v1108_v43 = vmul.f32 %v1100_v20, %v1076_v26  ;;  %v1134_v22 = vadd.f32 %v1133_v13, %v1077_v19  ;;  %v2504_v55 = vld [vmem:[#allocation37_spill] sm:$0xff] }
 0x152   :  { %v1109_v35 = vmul.f32 %v1101_v41, %v1077_v19  ;;  %v1124_v47 = vadd.f32 %v1122_v16, %v2287_v3  ;;  %v1140_v63 = vadd.f32 %v1139_v17, %v2500_v48  ;;  %v1130_v45 = vadd.f32 %v1128_v34, %v2503_v42 }
 0x153   :  { %v1110_v54 = vadd.f32 %v1106_v38, %v1102_v1  ;;  %v1111_v40 = vadd.f32 %v1107_v5, %v1103_v61  ;;  %v1112_v37 = vadd.f32 %v1108_v43, %v1104_v14  ;;  %v1105_v46 = vmul.f32 %v2237_v39, %v1073_v60 }
 0x154   :  { %1125 = vst [vmem:[#allocation2 + $0x8] sm:$0xff] %v1124_v47  ;;  %v1136_v32 = vadd.f32 %v1134_v22, %v2289_v62  ;;  %v1142_v11 = vadd.f32 %v1140_v63, %v2504_v55  ;;  %v1144_v26 = vadd.f32 %v1079_v57, %v1078_v58  ;;  %1131 = vst [vmem:[#allocation2 + $0x10] sm:$0xff] %v1130_v45 }
 0x155   :  { %v1114_v7 = vadd.f32 %v1111_v40, %v1110_v54  ;;  %v1150_v3 = vadd.f32 %v2502_v4, %v2501_v12  ;;  %v1156_v19 = vadd.f32 %v1083_v8, %v1082_v44  ;;  %v1162_v48 = vadd.f32 %v2301_v24, %v2299_v31  ;;  %v2506_v8 = vld [vmem:[#allocation39_spill] sm:$0xff] }
 0x156   :  { %v896_v1 = vadd.f32 %v2276_v15, %v674_v29  ;;  %v1085_v60 = vmul.f32 %v2237_v39, %v2308_v36  ;;  %v1113_v61 = vadd.f32 %v1109_v35, %v1105_v46  ;;  %1137 = vst [vmem:[#allocation2 + $0x18] sm:$0xff] %v1136_v32  ;;  %1143 = vst [vmem:[#allocation2 + $0x20] sm:$0xff] %v1142_v11 }
 0x157   :  { %v1145_v62 = vadd.f32 %v1144_v26, %v1080_v28  ;;  %v1115_v14 = vadd.f32 %v1114_v7, %v1112_v37  ;;  %v1151_v58 = vadd.f32 %v1150_v3, %v2281_v25  ;;  %v1157_v57 = vadd.f32 %v1156_v19, %v1084_v56  ;;  %v2505_v28 = vld [vmem:[#allocation38_spill] sm:$0xff] }
 0x158   :  { %v1163_v18 = vadd.f32 %v1162_v48, %v2303_v27 }
 0x159   :  { %v1146_v12 = vadd.f32 %v1145_v62, %v2329_v10  ;;  %v1116_v31 = vadd.f32 %v1115_v14, %v1113_v61  ;;  %v1152_v15 = vadd.f32 %v1151_v58, %v2285_v6  ;;  %v1158_v24 = vadd.f32 %v1157_v57, %v1085_v60 }
 0x15a   :  { %v1164_v39 = vadd.f32 %v1163_v18, %v2308_v36 }
 0x15b   :  { %v1148_v4 = vadd.f32 %v1146_v12, %v2291_v23  ;;  %v1118_v44 = vadd.f32 %v1116_v31, %v896_v1  ;;  %v1154_v29 = vadd.f32 %v1152_v15, %v2505_v28  ;;  %v1160_v25 = vadd.f32 %v1158_v24, %v2293_v2 }
 0x15c   :  { %v1166_v56 = vadd.f32 %v1164_v39, %v2506_v8 }
 0x15d   :  { %1149 = vst [vmem:[#allocation2 + $0x28] sm:$0xff] %v1148_v4  ;;  %1119 = vst [vmem:[#allocation2] sm:$0xff] %v1118_v44 }
 0x15e   :  { %1155 = vst [vmem:[#allocation2 + $0x30] sm:$0xff] %v1154_v29  ;;  %1161 = vst [vmem:[#allocation2 + $0x38] sm:$0xff] %v1160_v25 }
 0x15f   :  { %1167 = vst [vmem:[#allocation2 + $0x40] sm:$0xff] %v1166_v56 }
 0x160   :  { %1375 = shalt.err (!%p1372_p4)
}
 0x161   :  { %s1388_s13 = smov 128   ;;  %s1389_s3 = smov 8  }
 0x162   :  { %1179 = dma.vmem_to_hbm [thread:$0]  %s1174_s11, 1152, %s2385_s8, [#allocation3], %s1388_s13, %s1388_s13, %s1389_s3  }
 0x163   :  { %1384 = dma.done.wait [#allocation3], 1152  }
 0x164   :  { %1385 = vsyncadd [#allocation3], 4294966144 }
 0x165   :  { %1183 = vsyncpa [#allocation3], 1 }

</bundles_post_ra>
